<compile_context>
chip_gen: v7x
topology: tpu7x:2x2x1
jax: 0.10.0
libtpu: 0.0.40
codegen_flags: <defaults>
</compile_context>

<pallas_src>
import functools

import jax
import jax.numpy as jnp
from jax import lax
from jax.experimental import pallas as pl
from jax.experimental.pallas import tpu as pltpu

NEG_SLOPE = 0.2   # nn.LeakyReLU(negative_slope=0.2)
EPS = 1e-5        # BatchNorm eps
KCONV = 3         # transform: Conv2d kernel 3x3, pad 1
KSP = 7           # CBAM spatial gate: 7x7 conv, pad 3


# ---------------------------------------------------------------------------
# Fused kernel: LeakyReLU + 3x3 conv + BN + CBAM channel gate + spatial gate
# ---------------------------------------------------------------------------
def _block_kernel(N, H, W, Cin, Cout,
                  xin_ref, wc_ref, gamma_ref, beta_ref,
                  w1_ref, b1_ref, w2_ref, b2_ref,
                  g_ref, gt_ref, esel_ref, msp_ref, bnsp_ref,
                  out_ref,
                  srowc_ref, ppad_ref, srows_ref):
    Lin = W * Cin                 # lane width of one input row (128-aligned)
    Wd = W * Cout                 # lane-dense output width (= 128 in the test)
    NH = N * H
    W2 = 2 * W                    # (max | mean) map width
    f32 = jnp.float32

    # --- LeakyReLU(0.2) -----------------------------------------------------
    x = xin_ref[...].astype(f32)                              # (N, H, W*Cin)
    x = jnp.where(x >= 0.0, x, x * NEG_SLOPE)

    # --- stage the three dy-bands for the 3x3 conv.  W padding lives in the
    #     banded weight matrix, so every lane offset here is 128-aligned;
    #     only the two H-halo row slices are explicitly zeroed. --------------
    zrow = jnp.zeros((N, 1, Lin), f32)
    srowc_ref[:, 0:1, 0:Lin] = zrow                           # dy=0 top halo
    srowc_ref[:, 1:H, 0:Lin] = x[:, 0:H - 1, :]
    srowc_ref[:, :, Lin:2 * Lin] = x                          # dy=1 (aligned)
    srowc_ref[:, 0:H - 1, 2 * Lin:3 * Lin] = x[:, 1:H, :]     # dy=2
    srowc_ref[:, H - 1:H, 2 * Lin:3 * Lin] = zrow             # bottom halo

    # --- transform: 3x3 conv as ONE banded MXU matmul, K = 3*W*Cin ----------
    lhs = srowc_ref[...].reshape(NH, KCONV * Lin).astype(jnp.bfloat16)
    acc = jnp.dot(lhs, wc_ref[...], preferred_element_type=f32)    # (NH, Wd)
    # NOTE: conv bias omitted - it is exactly cancelled by the training-mode
    #       BatchNorm mean subtraction below (mean shifts equally, var same).

    # --- BatchNorm2d (training batch stats).  Per-channel folds via XLU
    #     coset rolls (no M=1 matmuls); result is already lane-replicated. ---
    s1 = jnp.sum(acc, axis=0, keepdims=True)                  # (1, Wd)
    s2 = jnp.sum(acc * acc, axis=0, keepdims=True)
    st = jnp.concatenate([s1, s2], axis=0)                    # (2, Wd)
    sh = Cout
    while sh < Wd:                                            # coset sum over W
        st = st + pltpu.roll(st, sh, 1)
        sh *= 2
    cnt = float(N * H * W)
    mean_t = st[0:1, :] * (1.0 / cnt)                         # (1, Wd)
    ex2_t = st[1:2, :] * (1.0 / cnt)
    # TODO(synk): E[x^2]-E[x]^2 cancels catastrophically for large-magnitude
    #             activations; switch to two-pass/Welford before scaling up.
    inv_t = lax.rsqrt(ex2_t - mean_t * mean_t + EPS)
    xb = (acc - mean_t) * inv_t * gamma_ref[...] + beta_ref[...]   # (NH, Wd)
    xb3 = xb.reshape(N, H, Wd)

    # --- CBAM channel gate: avg/max pool -> shared MLP -> sigmoid -----------
    hsum = jnp.sum(xb3, axis=1)                               # (N, Wd)
    hmax = jnp.max(xb3, axis=1)                               # (N, Wd)
    sh = Cout
    while sh < Wd:                                            # coset max over W
        hmax = jnp.maximum(hmax, pltpu.roll(hmax, sh, 1))
        sh *= 2
    pool = jnp.concatenate([hsum * (1.0 / float(H * W)),
                            hmax * (1.0 / float(W))], axis=0)  # (2N, Wd)
    pool_c = jnp.dot(pool, g_ref[...], preferred_element_type=f32)   # (2N, Cout)
    hid = jnp.maximum(
        jnp.dot(pool_c, w1_ref[...], preferred_element_type=f32) + b1_ref[...],
        0.0)
    mlp = jnp.dot(hid, w2_ref[...], preferred_element_type=f32) + b2_ref[...]
    ch_att = jax.nn.sigmoid(mlp[0:N, :] + mlp[N:2 * N, :])    # (N, Cout)
    ch_t = jnp.dot(ch_att, gt_ref[...], preferred_element_type=f32)  # (N, Wd) tiled
    xc3 = xb3 * ch_t.reshape(N, 1, Wd)                        # sublane broadcast
    xc = xc3.reshape(NH, Wd)

    # --- CBAM spatial gate ---------------------------------------------------
    # ONE wide 0/1-selection matmul -> c-major per-channel groups, then a short
    # static-slice VPU reduction for the per-pixel channel max / mean.
    sel = jnp.dot(xc.astype(jnp.bfloat16), esel_ref[...],
                  preferred_element_type=f32)                 # (NH, Cout*W)
    mx = sel[:, 0:W]
    sm = sel[:, 0:W]
    for c in range(1, Cout):
        blk = sel[:, c * W:(c + 1) * W]
        mx = jnp.maximum(mx, blk)
        sm = sm + blk
    maps = jnp.concatenate([mx, sm * (1.0 / float(Cout))], axis=1)   # (NH, 2W)

    # H halo (only 3 top / 3 bottom rows zeroed), dy-band staging for 7x7 conv
    zhalo = jnp.zeros((N, 3, W2), f32)
    ppad_ref[:, 0:3, :] = zhalo
    ppad_ref[:, H + 3:H + 6, :] = zhalo
    ppad_ref[:, 3:3 + H, :] = maps.reshape(N, H, W2)
    for dy in range(KSP):
        srows_ref[:, :, dy * W2:(dy + 1) * W2] = ppad_ref[:, dy:dy + H, :]

    # 7x7 (2->1) conv folded into ONE banded matmul; result replicated per co
    s = jnp.dot(srows_ref[...].reshape(NH, KSP * W2).astype(jnp.bfloat16),
                msp_ref[...], preferred_element_type=f32)     # (NH, Wd)
    smean = jnp.mean(s)                                       # BN(1ch) over batch
    svar = jnp.mean(s * s) - smean * smean                    # (repeats uniform)
    sn = (s - smean) * lax.rsqrt(svar + EPS) * bnsp_ref[0] + bnsp_ref[1]
    out_ref[...] = (xc * jax.nn.sigmoid(sn)).reshape(N, H, Wd)   # lane-dense store


# ---------------------------------------------------------------------------
# Wrapper: layout plumbing + banded/selection matrices built from the weights
# ---------------------------------------------------------------------------
def block_forward(xs, params):
    x = jnp.concatenate(xs, axis=1)                           # torch.cat(xs, dim=1), NCHW
    x = jnp.transpose(x, (0, 2, 3, 1)).astype(jnp.float32)    # -> NHWC
    N, H, W, Cin = x.shape
    Cout = params["bn_gamma"].shape[0]
    hidden = params["b1"].shape[0]
    Wd = W * Cout
    Lin = W * Cin
    assert H % 8 == 0, "H must be a multiple of 8 (layout-preserving reshapes)"
    assert W > 0 and (W & (W - 1)) == 0, "W must be a power of two (coset rolls)"
    assert Wd % 128 == 0, "W*Cout must be a multiple of 128 (lane-dense layout)"

    f32 = jnp.float32
    bf16 = jnp.bfloat16
    xin = x.reshape(N, H, Lin).astype(bf16)                   # lane-dense bf16 input

    # banded 3x3 conv matrix, SAME W-pad folded into the validity mask:
    # rows (dy, w_in, ci) x cols (w_out, co)
    wc = params["w_conv"].astype(f32)                         # (3,3,Cin,Cout) HWIO
    dxc = jnp.arange(W)[:, None] - jnp.arange(W)[None, :] + 1
    validc = (dxc >= 0) & (dxc < KCONV)
    gc = wc[:, jnp.clip(dxc, 0, KCONV - 1), :, :]             # (3, W, W, Cin, Cout)
    gc = jnp.where(validc[None, :, :, None, None], gc, 0.0)
    wc_band = jnp.transpose(gc, (0, 1, 3, 2, 4)).reshape(KCONV * Lin, Wd).astype(bf16)

    # banded 7x7 spatial conv: rows (dy, map, w_in) x cols (w_out), repeated per co
    wsp = params["w_sp"][..., 0].astype(f32)                  # (7,7,2) [dy, dx, map]
    dxs = jnp.arange(W)[:, None] - jnp.arange(W)[None, :] + 3
    valids = (dxs >= 0) & (dxs < KSP)
    gs = wsp[:, jnp.clip(dxs, 0, KSP - 1), :]                 # (7, W, W, 2)
    gs = jnp.where(valids[None, :, :, None], gs, 0.0)
    msp = jnp.transpose(gs, (0, 3, 1, 2)).reshape(KSP * 2 * W, W)
    msp = jnp.repeat(msp, Cout, axis=1).astype(bf16)          # (7*2*W, Wd)

    # channel fold / tile / selection helpers (exact 0/1 matrices)
    lane = jnp.arange(Wd)                                     # lane = w*Cout + c
    G = ((lane[:, None] % Cout) == jnp.arange(Cout)[None, :]).astype(f32)  # (Wd, Cout)
    GT = jnp.transpose(G)                                                  # (Cout, Wd)
    col = jnp.arange(Cout * W)                                # col = c*W + w
    Esel = (((lane[:, None] % Cout) == (col[None, :] // W)) &
            ((lane[:, None] // Cout) == (col[None, :] % W))).astype(bf16)  # (Wd, Cout*W)

    tile_c = lambda v: jnp.tile(v.reshape(1, Cout).astype(f32), (1, W))
    gamma_t = tile_c(params["bn_gamma"])
    beta_t = tile_c(params["bn_beta"])
    bnsp = jnp.stack([params["sp_gamma"], params["sp_beta"]]).astype(f32)

    vmem = pl.BlockSpec(memory_space=pltpu.MemorySpace.VMEM)
    smem = pl.BlockSpec(memory_space=pltpu.MemorySpace.SMEM)
    kernel = functools.partial(_block_kernel, N, H, W, Cin, Cout)

    out = pl.pallas_call(
        kernel,
        out_shape=jax.ShapeDtypeStruct((N, H, Wd), f32),
        in_specs=[vmem] * 12 + [smem],
        out_specs=vmem,
        scratch_shapes=[
            pltpu.VMEM((N, H, KCONV * Lin), f32),             # dy-banded 3x3 rows
            pltpu.VMEM((N, H + 6, 2 * W), f32),               # H-padded (max,mean) maps
            pltpu.VMEM((N, H, KSP * 2 * W), f32),             # dy-banded 7x7 rows
        ],
    )(xin, wc_band, gamma_t, beta_t,
      params["w1"].astype(f32), params["b1"].reshape(1, hidden).astype(f32),
      params["w2"].astype(f32), params["b2"].reshape(1, Cout).astype(f32),
      G, GT, Esel, msp, bnsp)

    y = out.reshape(N, H, W, Cout)
    return jnp.transpose(y, (0, 3, 1, 2))                     # back to NCHW


# ---------------------------------------------------------------------------
# Pure-JAX reference (same math, full f32) for a correctness check
# ---------------------------------------------------------------------------
def block_reference(xs, params):
    x = jnp.concatenate(xs, axis=1)
    x = jnp.transpose(x, (0, 2, 3, 1)).astype(jnp.float32)
    x = jnp.where(x >= 0.0, x, NEG_SLOPE * x)
    y = lax.conv_general_dilated(x, params["w_conv"], (1, 1), "SAME",
                                 dimension_numbers=("NHWC", "HWIO", "NHWC"))
    y = y + params["b_conv"]
    mean = y.mean(axis=(0, 1, 2), keepdims=True)
    var = ((y - mean) ** 2).mean(axis=(0, 1, 2), keepdims=True)
    y = (y - mean) / jnp.sqrt(var + EPS) * params["bn_gamma"] + params["bn_beta"]

    avg = y.mean(axis=(1, 2))
    mx = y.max(axis=(1, 2))

    def mlp(v):
        h = jnp.maximum(v @ params["w1"] + params["b1"], 0.0)
        return h @ params["w2"] + params["b2"]

    att = jax.nn.sigmoid(mlp(avg) + mlp(mx))
    y = y * att[:, None, None, :]

    comp = jnp.concatenate([y.max(axis=-1, keepdims=True),
                            y.mean(axis=-1, keepdims=True)], axis=-1)
    s = lax.conv_general_dilated(comp, params["w_sp"], (1, 1), "SAME",
                                 dimension_numbers=("NHWC", "HWIO", "NHWC"))
    sm = s.mean()
    sv = ((s - sm) ** 2).mean()
    s = (s - sm) / jnp.sqrt(sv + EPS) * params["sp_gamma"] + params["sp_beta"]
    y = y * jax.nn.sigmoid(s)
    return jnp.transpose(y, (0, 3, 1, 2))


def init_params(key, cin, cout, hidden):
    ks = jax.random.split(key, 7)
    p = {}
    p["w_conv"] = 0.1 * jax.random.normal(ks[0], (KCONV, KCONV, cin, cout), jnp.float32)
    p["b_conv"] = 0.05 * jax.random.normal(ks[1], (cout,), jnp.float32)
    p["bn_gamma"] = 1.0 + 0.1 * jax.random.normal(ks[2], (cout,), jnp.float32)
    p["bn_beta"] = 0.1 * jax.random.normal(ks[3], (cout,), jnp.float32)
    p["w1"] = 0.3 * jax.random.normal(ks[4], (cout, hidden), jnp.float32)   # Linear C -> C//r
    p["b1"] = jnp.zeros((hidden,), jnp.float32)
    p["w2"] = 0.3 * jax.random.normal(ks[5], (hidden, cout), jnp.float32)   # Linear C//r -> C
    p["b2"] = jnp.zeros((cout,), jnp.float32)
    p["w_sp"] = 0.1 * jax.random.normal(ks[6], (KSP, KSP, 2, 1), jnp.float32)  # 7x7, 2->1
    p["sp_gamma"] = jnp.float32(1.0)
    p["sp_beta"] = jnp.float32(0.0)
    return p


if __name__ == "__main__":
    key = jax.random.PRNGKey(0)
    k1, k2, kp = jax.random.split(key, 3)

    # Two inputs concatenated on the channel axis (Block.forward(*xs))
    N, H, W = 2, 16, 16
    c_each = 4
    cin = 2 * c_each           # transform in_channels = 8
    cout = 8                   # transform.out_channels
    hidden = 2                 # CBAM channel-gate reduction: 8 -> 2 -> 8

    x1 = jax.random.normal(k1, (N, c_each, H, W), jnp.float32)
    x2 = jax.random.normal(k2, (N, c_each, H, W), jnp.float32)
    params = init_params(kp, cin, cout, hidden)

    y = block_forward([x1, x2], params)
    y = jax.block_until_ready(y)

    y_ref = block_reference([x1, x2], params)
    err = float(jnp.max(jnp.abs(y - y_ref)))
    assert y.shape == (N, cout, H, W), y.shape
    # Tolerance covers bf16 MXU inputs on the 3x3 conv, the CBAM channel
    # selection and the 7x7 spatial conv; the 1-channel spatial BN divides by
    # the batch std, which amplifies the spatial-gate rounding.  Measured error
    # is O(1e-2); the bound is kept loose to avoid flaky failures.
    assert err < 1e-1, f"max abs err too large: {err}"
    print("KERNEL_OK")
</pallas_src>

<mosaic_0001>
module attributes {stable_mosaic.version = 11 : i64} {
  func.func @_block_kernel(%arg0: memref<2x16x128xbf16, #tpu.memory_space<vmem>>, %arg1: memref<384x128xbf16, #tpu.memory_space<vmem>>, %arg2: memref<1x128xf32, #tpu.memory_space<vmem>>, %arg3: memref<1x128xf32, #tpu.memory_space<vmem>>, %arg4: memref<8x2xf32, #tpu.memory_space<vmem>>, %arg5: memref<1x2xf32, #tpu.memory_space<vmem>>, %arg6: memref<2x8xf32, #tpu.memory_space<vmem>>, %arg7: memref<1x8xf32, #tpu.memory_space<vmem>>, %arg8: memref<128x8xf32, #tpu.memory_space<vmem>>, %arg9: memref<8x128xf32, #tpu.memory_space<vmem>>, %arg10: memref<128x128xbf16, #tpu.memory_space<vmem>>, %arg11: memref<224x128xbf16, #tpu.memory_space<vmem>>, %arg12: memref<2xf32, #tpu.memory_space<smem>>, %arg13: memref<2x16x128xf32, #tpu.memory_space<vmem>>, %arg14: memref<2x16x384xf32, #tpu.memory_space<vmem>>, %arg15: memref<2x22x32xf32, #tpu.memory_space<vmem>>, %arg16: memref<2x16x224xf32, #tpu.memory_space<vmem>>) attributes {dimension_semantics = [], scalar_prefetch = 0 : i64, scratch_operands = 3 : i64, tpu.core_type = #tpu.core_type<tc>} {
    %c0 = arith.constant 0 : index
    %c0_0 = arith.constant 0 : index
    %c0_1 = arith.constant 0 : index
    %0 = vector.load %arg0[%c0, %c0_0, %c0_1] : memref<2x16x128xbf16, #tpu.memory_space<vmem>>, vector<2x16x128xbf16>
    %1 = arith.extf %0 : vector<2x16x128xbf16> to vector<2x16x128xf32>
    %cst = arith.constant 0.000000e+00 : f32
    %2 = vector.broadcast %cst : f32 to vector<2x16x128xf32>
    %3 = arith.cmpf oge, %1, %2 : vector<2x16x128xf32>
    %cst_2 = arith.constant 2.000000e-01 : f32
    %4 = vector.broadcast %cst_2 : f32 to vector<2x16x128xf32>
    %5 = arith.mulf %1, %4 : vector<2x16x128xf32>
    %6 = arith.select %3, %1, %5 : vector<2x16x128xi1>, vector<2x16x128xf32>
    %cst_3 = arith.constant 0.000000e+00 : f32
    %7 = vector.broadcast %cst_3 : f32 to vector<2x1x128xf32>
    %c0_4 = arith.constant 0 : index
    %c0_5 = arith.constant 0 : index
    %c0_6 = arith.constant 0 : index
    %8 = vector.load %arg14[%c0_4, %c0_5, %c0_6] : memref<2x16x384xf32, #tpu.memory_space<vmem>>, vector<2x1x128xf32>
    tpu.vector_store %arg14[%c0_4, %c0_5, %c0_6], %7 {strides = array<i32>} : memref<2x16x384xf32, #tpu.memory_space<vmem>>, vector<2x1x128xf32>,
    %9 = vector.extract_strided_slice %6 {offsets = [0, 0, 0], sizes = [2, 15, 128], strides = [1, 1, 1]} : vector<2x16x128xf32> to vector<2x15x128xf32>
    %c0_7 = arith.constant 0 : index
    %c1 = arith.constant 1 : index
    %c0_8 = arith.constant 0 : index
    %10 = vector.load %arg14[%c0_7, %c1, %c0_8] : memref<2x16x384xf32, #tpu.memory_space<vmem>>, vector<2x15x128xf32>
    tpu.vector_store %arg14[%c0_7, %c1, %c0_8], %9 {strides = array<i32>} : memref<2x16x384xf32, #tpu.memory_space<vmem>>, vector<2x15x128xf32>,
    %c0_9 = arith.constant 0 : index
    %c0_10 = arith.constant 0 : index
    %c128 = arith.constant 128 : index
    %11 = vector.load %arg14[%c0_9, %c0_10, %c128] : memref<2x16x384xf32, #tpu.memory_space<vmem>>, vector<2x16x128xf32>
    tpu.vector_store %arg14[%c0_9, %c0_10, %c128], %6 {strides = array<i32>} : memref<2x16x384xf32, #tpu.memory_space<vmem>>, vector<2x16x128xf32>,
    %12 = vector.extract_strided_slice %6 {offsets = [0, 1, 0], sizes = [2, 15, 128], strides = [1, 1, 1]} : vector<2x16x128xf32> to vector<2x15x128xf32>
    %c0_11 = arith.constant 0 : index
    %c0_12 = arith.constant 0 : index
    %c256 = arith.constant 256 : index
    %13 = vector.load %arg14[%c0_11, %c0_12, %c256] : memref<2x16x384xf32, #tpu.memory_space<vmem>>, vector<2x15x128xf32>
    tpu.vector_store %arg14[%c0_11, %c0_12, %c256], %12 {strides = array<i32>} : memref<2x16x384xf32, #tpu.memory_space<vmem>>, vector<2x15x128xf32>,
    %c0_13 = arith.constant 0 : index
    %c15 = arith.constant 15 : index
    %c256_14 = arith.constant 256 : index
    %14 = vector.load %arg14[%c0_13, %c15, %c256_14] : memref<2x16x384xf32, #tpu.memory_space<vmem>>, vector<2x1x128xf32>
    tpu.vector_store %arg14[%c0_13, %c15, %c256_14], %7 {strides = array<i32>} : memref<2x16x384xf32, #tpu.memory_space<vmem>>, vector<2x1x128xf32>,
    %c0_15 = arith.constant 0 : index
    %c0_16 = arith.constant 0 : index
    %c0_17 = arith.constant 0 : index
    %15 = vector.load %arg14[%c0_15, %c0_16, %c0_17] : memref<2x16x384xf32, #tpu.memory_space<vmem>>, vector<2x16x384xf32>
    %16 = vector.shape_cast %15 : vector<2x16x384xf32> to vector<32x384xf32>
    %17 = arith.truncf %16 : vector<32x384xf32> to vector<32x384xbf16>
    %c0_18 = arith.constant 0 : index
    %c0_19 = arith.constant 0 : index
    %18 = vector.load %arg1[%c0_18, %c0_19] : memref<384x128xbf16, #tpu.memory_space<vmem>>, vector<384x128xbf16>
    %cst_20 = arith.constant dense<0.000000e+00> : vector<32x128xf32>
    %19 = tpu.matmul %17, %18, %cst_20 {dimension_numbers = #tpu.dot_dimension_numbers<[1], [0], [0], [1], [0, 0, 1, 1], [], []>} : vector<32x384xbf16>, vector<384x128xbf16>, vector<32x128xf32> -> vector<32x128xf32>
    %cst_21 = arith.constant dense<0.000000e+00> : vector<128xf32>
    %20 = vector.multi_reduction <add>, %19, %cst_21 [0] : vector<32x128xf32> to vector<128xf32>
    %21 = vector.shape_cast %20 : vector<128xf32> to vector<1x128xf32>
    %22 = arith.mulf %19, %19 : vector<32x128xf32>
    %cst_22 = arith.constant dense<0.000000e+00> : vector<128xf32>
    %23 = vector.multi_reduction <add>, %22, %cst_22 [0] : vector<32x128xf32> to vector<128xf32>
    %24 = vector.shape_cast %23 : vector<128xf32> to vector<1x128xf32>
    %25 = tpu.concatenate %21, %24 in 0 : vector<1x128xf32>, vector<1x128xf32> -> vector<2x128xf32>
    %c8_i32 = arith.constant 8 : i32
    %26 = tpu.dynamic_rotate %25 by %c8_i32 dim 1 : vector<2x128xf32>, i32 -> vector<2x128xf32>
    %27 = arith.addf %25, %26 : vector<2x128xf32>
    %c16_i32 = arith.constant 16 : i32
    %28 = tpu.dynamic_rotate %27 by %c16_i32 dim 1 : vector<2x128xf32>, i32 -> vector<2x128xf32>
    %29 = arith.addf %27, %28 : vector<2x128xf32>
    %c32_i32 = arith.constant 32 : i32
    %30 = tpu.dynamic_rotate %29 by %c32_i32 dim 1 : vector<2x128xf32>, i32 -> vector<2x128xf32>
    %31 = arith.addf %29, %30 : vector<2x128xf32>
    %c64_i32 = arith.constant 64 : i32
    %32 = tpu.dynamic_rotate %31 by %c64_i32 dim 1 : vector<2x128xf32>, i32 -> vector<2x128xf32>
    %33 = arith.addf %31, %32 : vector<2x128xf32>
    %34 = vector.extract_strided_slice %33 {offsets = [0, 0], sizes = [1, 128], strides = [1, 1]} : vector<2x128xf32> to vector<1x128xf32>
    %cst_23 = arith.constant 0.001953125 : f32
    %35 = vector.broadcast %cst_23 : f32 to vector<1x128xf32>
    %36 = arith.mulf %34, %35 : vector<1x128xf32>
    %37 = vector.extract_strided_slice %33 {offsets = [1, 0], sizes = [1, 128], strides = [1, 1]} : vector<2x128xf32> to vector<1x128xf32>
    %cst_24 = arith.constant 0.001953125 : f32
    %38 = vector.broadcast %cst_24 : f32 to vector<1x128xf32>
    %39 = arith.mulf %37, %38 : vector<1x128xf32>
    %40 = arith.mulf %36, %36 : vector<1x128xf32>
    %41 = arith.subf %39, %40 : vector<1x128xf32>
    %cst_25 = arith.constant 9.99999974E-6 : f32
    %42 = vector.broadcast %cst_25 : f32 to vector<1x128xf32>
    %43 = arith.addf %41, %42 : vector<1x128xf32>
    %44 = math.rsqrt %43 : vector<1x128xf32>
    %45 = vector.broadcast %36 : vector<1x128xf32> to vector<32x128xf32>
    %46 = arith.subf %19, %45 : vector<32x128xf32>
    %47 = vector.broadcast %44 : vector<1x128xf32> to vector<32x128xf32>
    %48 = arith.mulf %46, %47 : vector<32x128xf32>
    %c0_26 = arith.constant 0 : index
    %c0_27 = arith.constant 0 : index
    %49 = vector.load %arg2[%c0_26, %c0_27] : memref<1x128xf32, #tpu.memory_space<vmem>>, vector<1x128xf32>
    %50 = vector.broadcast %49 : vector<1x128xf32> to vector<32x128xf32>
    %51 = arith.mulf %48, %50 : vector<32x128xf32>
    %c0_28 = arith.constant 0 : index
    %c0_29 = arith.constant 0 : index
    %52 = vector.load %arg3[%c0_28, %c0_29] : memref<1x128xf32, #tpu.memory_space<vmem>>, vector<1x128xf32>
    %53 = vector.broadcast %52 : vector<1x128xf32> to vector<32x128xf32>
    %54 = arith.addf %51, %53 : vector<32x128xf32>
    %55 = vector.shape_cast %54 : vector<32x128xf32> to vector<2x16x128xf32>
    %cst_30 = arith.constant dense<0.000000e+00> : vector<2x128xf32>
    %56 = vector.multi_reduction <add>, %55, %cst_30 [1] : vector<2x16x128xf32> to vector<2x128xf32>
    %cst_31 = arith.constant dense<0xFF800000> : vector<2x128xf32>
    %57 = vector.multi_reduction <maximumf>, %55, %cst_31 [1] : vector<2x16x128xf32> to vector<2x128xf32>
    %c8_i32_32 = arith.constant 8 : i32
    %58 = tpu.dynamic_rotate %57 by %c8_i32_32 dim 1 : vector<2x128xf32>, i32 -> vector<2x128xf32>
    %59 = arith.maximumf %57, %58 : vector<2x128xf32>
    %c16_i32_33 = arith.constant 16 : i32
    %60 = tpu.dynamic_rotate %59 by %c16_i32_33 dim 1 : vector<2x128xf32>, i32 -> vector<2x128xf32>
    %61 = arith.maximumf %59, %60 : vector<2x128xf32>
    %c32_i32_34 = arith.constant 32 : i32
    %62 = tpu.dynamic_rotate %61 by %c32_i32_34 dim 1 : vector<2x128xf32>, i32 -> vector<2x128xf32>
    %63 = arith.maximumf %61, %62 : vector<2x128xf32>
    %c64_i32_35 = arith.constant 64 : i32
    %64 = tpu.dynamic_rotate %63 by %c64_i32_35 dim 1 : vector<2x128xf32>, i32 -> vector<2x128xf32>
    %65 = arith.maximumf %63, %64 : vector<2x128xf32>
    %cst_36 = arith.constant 3.906250e-03 : f32
    %66 = vector.broadcast %cst_36 : f32 to vector<2x128xf32>
    %67 = arith.mulf %56, %66 : vector<2x128xf32>
    %cst_37 = arith.constant 6.250000e-02 : f32
    %68 = vector.broadcast %cst_37 : f32 to vector<2x128xf32>
    %69 = arith.mulf %65, %68 : vector<2x128xf32>
    %70 = tpu.concatenate %67, %69 in 0 : vector<2x128xf32>, vector<2x128xf32> -> vector<4x128xf32>
    %c0_38 = arith.constant 0 : index
    %c0_39 = arith.constant 0 : index
    %71 = vector.load %arg8[%c0_38, %c0_39] : memref<128x8xf32, #tpu.memory_space<vmem>>, vector<128x8xf32>
    %cst_40 = arith.constant dense<0.000000e+00> : vector<4x8xf32>
    %72 = tpu.matmul %70, %71, %cst_40 {dimension_numbers = #tpu.dot_dimension_numbers<[1], [0], [0], [1], [0, 0, 1, 1], [], []>} : vector<4x128xf32>, vector<128x8xf32>, vector<4x8xf32> -> vector<4x8xf32>
    %c0_41 = arith.constant 0 : index
    %c0_42 = arith.constant 0 : index
    %73 = vector.load %arg4[%c0_41, %c0_42] : memref<8x2xf32, #tpu.memory_space<vmem>>, vector<8x2xf32>
    %cst_43 = arith.constant dense<0.000000e+00> : vector<4x2xf32>
    %74 = tpu.matmul %72, %73, %cst_43 {dimension_numbers = #tpu.dot_dimension_numbers<[1], [0], [0], [1], [0, 0, 1, 1], [], []>} : vector<4x8xf32>, vector<8x2xf32>, vector<4x2xf32> -> vector<4x2xf32>
    %c0_44 = arith.constant 0 : index
    %c0_45 = arith.constant 0 : index
    %75 = vector.load %arg5[%c0_44, %c0_45] : memref<1x2xf32, #tpu.memory_space<vmem>>, vector<1x2xf32>
    %76 = vector.broadcast %75 : vector<1x2xf32> to vector<4x2xf32>
    %77 = arith.addf %74, %76 : vector<4x2xf32>
    %cst_46 = arith.constant 0.000000e+00 : f32
    %78 = vector.broadcast %cst_46 : f32 to vector<4x2xf32>
    %79 = arith.maximumf %77, %78 : vector<4x2xf32>
    %c0_47 = arith.constant 0 : index
    %c0_48 = arith.constant 0 : index
    %80 = vector.load %arg6[%c0_47, %c0_48] : memref<2x8xf32, #tpu.memory_space<vmem>>, vector<2x8xf32>
    %cst_49 = arith.constant dense<0.000000e+00> : vector<4x8xf32>
    %81 = tpu.matmul %79, %80, %cst_49 {dimension_numbers = #tpu.dot_dimension_numbers<[1], [0], [0], [1], [0, 0, 1, 1], [], []>} : vector<4x2xf32>, vector<2x8xf32>, vector<4x8xf32> -> vector<4x8xf32>
    %c0_50 = arith.constant 0 : index
    %c0_51 = arith.constant 0 : index
    %82 = vector.load %arg7[%c0_50, %c0_51] : memref<1x8xf32, #tpu.memory_space<vmem>>, vector<1x8xf32>
    %83 = vector.broadcast %82 : vector<1x8xf32> to vector<4x8xf32>
    %84 = arith.addf %81, %83 : vector<4x8xf32>
    %85 = vector.extract_strided_slice %84 {offsets = [0, 0], sizes = [2, 8], strides = [1, 1]} : vector<4x8xf32> to vector<2x8xf32>
    %86 = vector.extract_strided_slice %84 {offsets = [2, 0], sizes = [2, 8], strides = [1, 1]} : vector<4x8xf32> to vector<2x8xf32>
    %87 = arith.addf %85, %86 : vector<2x8xf32>
    %88 = arith.negf %87 : vector<2x8xf32>
    %89 = math.exp %88 : vector<2x8xf32>
    %cst_52 = arith.constant 1.000000e+00 : f32
    %90 = vector.broadcast %cst_52 : f32 to vector<2x8xf32>
    %91 = arith.addf %90, %89 : vector<2x8xf32>
    %92 = arith.divf %90, %91 : vector<2x8xf32>
    %c0_53 = arith.constant 0 : index
    %c0_54 = arith.constant 0 : index
    %93 = vector.load %arg9[%c0_53, %c0_54] : memref<8x128xf32, #tpu.memory_space<vmem>>, vector<8x128xf32>
    %cst_55 = arith.constant dense<0.000000e+00> : vector<2x128xf32>
    %94 = tpu.matmul %92, %93, %cst_55 {dimension_numbers = #tpu.dot_dimension_numbers<[1], [0], [0], [1], [0, 0, 1, 1], [], []>} : vector<2x8xf32>, vector<8x128xf32>, vector<2x128xf32> -> vector<2x128xf32>
    %95 = vector.shape_cast %94 : vector<2x128xf32> to vector<2x1x128xf32>
    %96 = vector.broadcast %95 : vector<2x1x128xf32> to vector<2x16x128xf32>
    %97 = arith.mulf %55, %96 : vector<2x16x128xf32>
    %98 = vector.shape_cast %97 : vector<2x16x128xf32> to vector<32x128xf32>
    %99 = arith.truncf %98 : vector<32x128xf32> to vector<32x128xbf16>
    %c0_56 = arith.constant 0 : index
    %c0_57 = arith.constant 0 : index
    %100 = vector.load %arg10[%c0_56, %c0_57] : memref<128x128xbf16, #tpu.memory_space<vmem>>, vector<128x128xbf16>
    %cst_58 = arith.constant dense<0.000000e+00> : vector<32x128xf32>
    %101 = tpu.matmul %99, %100, %cst_58 {dimension_numbers = #tpu.dot_dimension_numbers<[1], [0], [0], [1], [0, 0, 1, 1], [], []>} : vector<32x128xbf16>, vector<128x128xbf16>, vector<32x128xf32> -> vector<32x128xf32>
    %102 = vector.extract_strided_slice %101 {offsets = [0, 0], sizes = [32, 16], strides = [1, 1]} : vector<32x128xf32> to vector<32x16xf32>
    %103 = vector.extract_strided_slice %101 {offsets = [0, 0], sizes = [32, 16], strides = [1, 1]} : vector<32x128xf32> to vector<32x16xf32>
    %104 = vector.extract_strided_slice %101 {offsets = [0, 16], sizes = [32, 16], strides = [1, 1]} : vector<32x128xf32> to vector<32x16xf32>
    %105 = arith.maximumf %102, %104 : vector<32x16xf32>
    %106 = arith.addf %103, %104 : vector<32x16xf32>
    %107 = vector.extract_strided_slice %101 {offsets = [0, 32], sizes = [32, 16], strides = [1, 1]} : vector<32x128xf32> to vector<32x16xf32>
    %108 = arith.maximumf %105, %107 : vector<32x16xf32>
    %109 = arith.addf %106, %107 : vector<32x16xf32>
    %110 = vector.extract_strided_slice %101 {offsets = [0, 48], sizes = [32, 16], strides = [1, 1]} : vector<32x128xf32> to vector<32x16xf32>
    %111 = arith.maximumf %108, %110 : vector<32x16xf32>
    %112 = arith.addf %109, %110 : vector<32x16xf32>
    %113 = vector.extract_strided_slice %101 {offsets = [0, 64], sizes = [32, 16], strides = [1, 1]} : vector<32x128xf32> to vector<32x16xf32>
    %114 = arith.maximumf %111, %113 : vector<32x16xf32>
    %115 = arith.addf %112, %113 : vector<32x16xf32>
    %116 = vector.extract_strided_slice %101 {offsets = [0, 80], sizes = [32, 16], strides = [1, 1]} : vector<32x128xf32> to vector<32x16xf32>
    %117 = arith.maximumf %114, %116 : vector<32x16xf32>
    %118 = arith.addf %115, %116 : vector<32x16xf32>
    %119 = vector.extract_strided_slice %101 {offsets = [0, 96], sizes = [32, 16], strides = [1, 1]} : vector<32x128xf32> to vector<32x16xf32>
    %120 = arith.maximumf %117, %119 : vector<32x16xf32>
    %121 = arith.addf %118, %119 : vector<32x16xf32>
    %122 = vector.extract_strided_slice %101 {offsets = [0, 112], sizes = [32, 16], strides = [1, 1]} : vector<32x128xf32> to vector<32x16xf32>
    %123 = arith.maximumf %120, %122 : vector<32x16xf32>
    %124 = arith.addf %121, %122 : vector<32x16xf32>
    %cst_59 = arith.constant 1.250000e-01 : f32
    %125 = vector.broadcast %cst_59 : f32 to vector<32x16xf32>
    %126 = arith.mulf %124, %125 : vector<32x16xf32>
    %127 = tpu.concatenate %123, %126 in 1 : vector<32x16xf32>, vector<32x16xf32> -> vector<32x32xf32>
    %cst_60 = arith.constant 0.000000e+00 : f32
    %128 = vector.broadcast %cst_60 : f32 to vector<2x3x32xf32>
    %c0_61 = arith.constant 0 : index
    %c0_62 = arith.constant 0 : index
    %c0_63 = arith.constant 0 : index
    %129 = vector.load %arg15[%c0_61, %c0_62, %c0_63] : memref<2x22x32xf32, #tpu.memory_space<vmem>>, vector<2x3x32xf32>
    tpu.vector_store %arg15[%c0_61, %c0_62, %c0_63], %128 {strides = array<i32>} : memref<2x22x32xf32, #tpu.memory_space<vmem>>, vector<2x3x32xf32>,
    %c0_64 = arith.constant 0 : index
    %c19 = arith.constant 19 : index
    %c0_65 = arith.constant 0 : index
    %130 = vector.load %arg15[%c0_64, %c19, %c0_65] : memref<2x22x32xf32, #tpu.memory_space<vmem>>, vector<2x3x32xf32>
    tpu.vector_store %arg15[%c0_64, %c19, %c0_65], %128 {strides = array<i32>} : memref<2x22x32xf32, #tpu.memory_space<vmem>>, vector<2x3x32xf32>,
    %131 = vector.shape_cast %127 : vector<32x32xf32> to vector<2x16x32xf32>
    %c0_66 = arith.constant 0 : index
    %c3 = arith.constant 3 : index
    %c0_67 = arith.constant 0 : index
    %132 = vector.load %arg15[%c0_66, %c3, %c0_67] : memref<2x22x32xf32, #tpu.memory_space<vmem>>, vector<2x16x32xf32>
    tpu.vector_store %arg15[%c0_66, %c3, %c0_67], %131 {strides = array<i32>} : memref<2x22x32xf32, #tpu.memory_space<vmem>>, vector<2x16x32xf32>,
    %c0_68 = arith.constant 0 : index
    %c0_69 = arith.constant 0 : index
    %c0_70 = arith.constant 0 : index
    %133 = vector.load %arg15[%c0_68, %c0_69, %c0_70] : memref<2x22x32xf32, #tpu.memory_space<vmem>>, vector<2x16x32xf32>
    %c0_71 = arith.constant 0 : index
    %c0_72 = arith.constant 0 : index
    %c0_73 = arith.constant 0 : index
    %134 = vector.load %arg16[%c0_71, %c0_72, %c0_73] : memref<2x16x224xf32, #tpu.memory_space<vmem>>, vector<2x16x32xf32>
    tpu.vector_store %arg16[%c0_71, %c0_72, %c0_73], %133 {strides = array<i32>} : memref<2x16x224xf32, #tpu.memory_space<vmem>>, vector<2x16x32xf32>,
    %c0_74 = arith.constant 0 : index
    %c1_75 = arith.constant 1 : index
    %c0_76 = arith.constant 0 : index
    %135 = vector.load %arg15[%c0_74, %c1_75, %c0_76] : memref<2x22x32xf32, #tpu.memory_space<vmem>>, vector<2x16x32xf32>
    %c0_77 = arith.constant 0 : index
    %c0_78 = arith.constant 0 : index
    %c32 = arith.constant 32 : index
    %136 = vector.load %arg16[%c0_77, %c0_78, %c32] : memref<2x16x224xf32, #tpu.memory_space<vmem>>, vector<2x16x32xf32>
    tpu.vector_store %arg16[%c0_77, %c0_78, %c32], %135 {strides = array<i32>} : memref<2x16x224xf32, #tpu.memory_space<vmem>>, vector<2x16x32xf32>,
    %c0_79 = arith.constant 0 : index
    %c2 = arith.constant 2 : index
    %c0_80 = arith.constant 0 : index
    %137 = vector.load %arg15[%c0_79, %c2, %c0_80] : memref<2x22x32xf32, #tpu.memory_space<vmem>>, vector<2x16x32xf32>
    %c0_81 = arith.constant 0 : index
    %c0_82 = arith.constant 0 : index
    %c64 = arith.constant 64 : index
    %138 = vector.load %arg16[%c0_81, %c0_82, %c64] : memref<2x16x224xf32, #tpu.memory_space<vmem>>, vector<2x16x32xf32>
    tpu.vector_store %arg16[%c0_81, %c0_82, %c64], %137 {strides = array<i32>} : memref<2x16x224xf32, #tpu.memory_space<vmem>>, vector<2x16x32xf32>,
    %c0_83 = arith.constant 0 : index
    %c3_84 = arith.constant 3 : index
    %c0_85 = arith.constant 0 : index
    %139 = vector.load %arg15[%c0_83, %c3_84, %c0_85] : memref<2x22x32xf32, #tpu.memory_space<vmem>>, vector<2x16x32xf32>
    %c0_86 = arith.constant 0 : index
    %c0_87 = arith.constant 0 : index
    %c96 = arith.constant 96 : index
    %140 = vector.load %arg16[%c0_86, %c0_87, %c96] : memref<2x16x224xf32, #tpu.memory_space<vmem>>, vector<2x16x32xf32>
    tpu.vector_store %arg16[%c0_86, %c0_87, %c96], %139 {strides = array<i32>} : memref<2x16x224xf32, #tpu.memory_space<vmem>>, vector<2x16x32xf32>,
    %c0_88 = arith.constant 0 : index
    %c4 = arith.constant 4 : index
    %c0_89 = arith.constant 0 : index
    %141 = vector.load %arg15[%c0_88, %c4, %c0_89] : memref<2x22x32xf32, #tpu.memory_space<vmem>>, vector<2x16x32xf32>
    %c0_90 = arith.constant 0 : index
    %c0_91 = arith.constant 0 : index
    %c128_92 = arith.constant 128 : index
    %142 = vector.load %arg16[%c0_90, %c0_91, %c128_92] : memref<2x16x224xf32, #tpu.memory_space<vmem>>, vector<2x16x32xf32>
    tpu.vector_store %arg16[%c0_90, %c0_91, %c128_92], %141 {strides = array<i32>} : memref<2x16x224xf32, #tpu.memory_space<vmem>>, vector<2x16x32xf32>,
    %c0_93 = arith.constant 0 : index
    %c5 = arith.constant 5 : index
    %c0_94 = arith.constant 0 : index
    %143 = vector.load %arg15[%c0_93, %c5, %c0_94] : memref<2x22x32xf32, #tpu.memory_space<vmem>>, vector<2x16x32xf32>
    %c0_95 = arith.constant 0 : index
    %c0_96 = arith.constant 0 : index
    %c160 = arith.constant 160 : index
    %144 = vector.load %arg16[%c0_95, %c0_96, %c160] : memref<2x16x224xf32, #tpu.memory_space<vmem>>, vector<2x16x32xf32>
    tpu.vector_store %arg16[%c0_95, %c0_96, %c160], %143 {strides = array<i32>} : memref<2x16x224xf32, #tpu.memory_space<vmem>>, vector<2x16x32xf32>,
    %c0_97 = arith.constant 0 : index
    %c6 = arith.constant 6 : index
    %c0_98 = arith.constant 0 : index
    %145 = vector.load %arg15[%c0_97, %c6, %c0_98] : memref<2x22x32xf32, #tpu.memory_space<vmem>>, vector<2x16x32xf32>
    %c0_99 = arith.constant 0 : index
    %c0_100 = arith.constant 0 : index
    %c192 = arith.constant 192 : index
    %146 = vector.load %arg16[%c0_99, %c0_100, %c192] : memref<2x16x224xf32, #tpu.memory_space<vmem>>, vector<2x16x32xf32>
    tpu.vector_store %arg16[%c0_99, %c0_100, %c192], %145 {strides = array<i32>} : memref<2x16x224xf32, #tpu.memory_space<vmem>>, vector<2x16x32xf32>,
    %c0_101 = arith.constant 0 : index
    %c0_102 = arith.constant 0 : index
    %c0_103 = arith.constant 0 : index
    %147 = vector.load %arg16[%c0_101, %c0_102, %c0_103] : memref<2x16x224xf32, #tpu.memory_space<vmem>>, vector<2x16x224xf32>
    %148 = vector.shape_cast %147 : vector<2x16x224xf32> to vector<32x224xf32>
    %149 = arith.truncf %148 : vector<32x224xf32> to vector<32x224xbf16>
    %c0_104 = arith.constant 0 : index
    %c0_105 = arith.constant 0 : index
    %150 = vector.load %arg11[%c0_104, %c0_105] : memref<224x128xbf16, #tpu.memory_space<vmem>>, vector<224x128xbf16>
    %cst_106 = arith.constant dense<0.000000e+00> : vector<32x128xf32>
    %151 = tpu.matmul %149, %150, %cst_106 {dimension_numbers = #tpu.dot_dimension_numbers<[1], [0], [0], [1], [0, 0, 1, 1], [], []>} : vector<32x224xbf16>, vector<224x128xbf16>, vector<32x128xf32> -> vector<32x128xf32>
    %152 = vector.shape_cast %151 : vector<32x128xf32> to vector<1x32x128xf32>
    %cst_107 = arith.constant dense<0.000000e+00> : vector<1xf32>
    %153 = vector.multi_reduction <add>, %152, %cst_107 [1, 2] : vector<1x32x128xf32> to vector<1xf32>
    %154 = vector.shape_cast %153 : vector<1xf32> to vector<1x1x1xf32>
    %155 = vector.extract %154[0, 0, 0] : f32 from vector<1x1x1xf32>
    %cst_108 = arith.constant 4.096000e+03 : f32
    %156 = arith.divf %155, %cst_108 : f32
    %157 = arith.mulf %151, %151 : vector<32x128xf32>
    %158 = vector.shape_cast %157 : vector<32x128xf32> to vector<1x32x128xf32>
    %cst_109 = arith.constant dense<0.000000e+00> : vector<1xf32>
    %159 = vector.multi_reduction <add>, %158, %cst_109 [1, 2] : vector<1x32x128xf32> to vector<1xf32>
    %160 = vector.shape_cast %159 : vector<1xf32> to vector<1x1x1xf32>
    %161 = vector.extract %160[0, 0, 0] : f32 from vector<1x1x1xf32>
    %cst_110 = arith.constant 4.096000e+03 : f32
    %162 = arith.divf %161, %cst_110 : f32
    %163 = arith.mulf %156, %156 : f32
    %164 = arith.subf %162, %163 : f32
    %165 = vector.broadcast %156 : f32 to vector<32x128xf32>
    %166 = arith.subf %151, %165 : vector<32x128xf32>
    %cst_111 = arith.constant 9.99999974E-6 : f32
    %167 = arith.addf %164, %cst_111 : f32
    %168 = math.rsqrt %167 : f32
    %169 = vector.broadcast %168 : f32 to vector<32x128xf32>
    %170 = arith.mulf %166, %169 : vector<32x128xf32>
    %c0_112 = arith.constant 0 : index
    %171 = memref.load %arg12[%c0_112] : memref<2xf32, #tpu.memory_space<smem>>
    %172 = vector.broadcast %171 : f32 to vector<32x128xf32>
    %173 = arith.mulf %170, %172 : vector<32x128xf32>
    %c1_113 = arith.constant 1 : index
    %174 = memref.load %arg12[%c1_113] : memref<2xf32, #tpu.memory_space<smem>>
    %175 = vector.broadcast %174 : f32 to vector<32x128xf32>
    %176 = arith.addf %173, %175 : vector<32x128xf32>
    %177 = arith.negf %176 : vector<32x128xf32>
    %178 = math.exp %177 : vector<32x128xf32>
    %cst_114 = arith.constant 1.000000e+00 : f32
    %179 = vector.broadcast %cst_114 : f32 to vector<32x128xf32>
    %180 = arith.addf %179, %178 : vector<32x128xf32>
    %181 = arith.divf %179, %180 : vector<32x128xf32>
    %182 = arith.mulf %98, %181 : vector<32x128xf32>
    %183 = vector.shape_cast %182 : vector<32x128xf32> to vector<2x16x128xf32>
    %c0_115 = arith.constant 0 : index
    %c0_116 = arith.constant 0 : index
    %c0_117 = arith.constant 0 : index
    %184 = vector.load %arg13[%c0_115, %c0_116, %c0_117] : memref<2x16x128xf32, #tpu.memory_space<vmem>>, vector<2x16x128xf32>
    tpu.vector_store %arg13[%c0_115, %c0_116, %c0_117], %183 {strides = array<i32>} : memref<2x16x128xf32, #tpu.memory_space<vmem>>, vector<2x16x128xf32>,
    return
  }
}

</mosaic_0001>

<bundles_post_ra>
// kernel: tpu_custom_call.1
= control target key start
LH: loop header
LB: loop body
LE: loop exit
PB: predicated region body
PF: predicated region fallthrough
CT: control target
= control target key end

     0   :  { %18 = vsyncpa [#allocation6], 0  ;;  %s2835_s0 = inlined_call_operand.hbm [shape: bf16[2,16,128], index: 0, kind: input, shape index: {}]   ;;  %s2836_s1 = inlined_call_operand.hbm [shape: bf16[384,128], index: 1, kind: input, shape index: {}]   ;;  %s2837_s2 = inlined_call_operand.vmem [shape: f32[1,128], index: 2, kind: input, shape index: {}]   ;;  %s2838_s3 = inlined_call_operand.hbm [shape: f32[1,128], index: 3, kind: input, shape index: {}]   ;;  %s2839_s4 = inlined_call_operand.vmem [shape: f32[8,2], index: 4, kind: input, shape index: {}]   ;;  %s2840_s5 = inlined_call_operand.hbm [shape: f32[1,2], index: 5, kind: input, shape index: {}]   ;;  %s2841_s6 = inlined_call_operand.vmem [shape: f32[2,8], index: 6, kind: input, shape index: {}]   ;;  %s2842_s7 = inlined_call_operand.hbm [shape: f32[1,8], index: 7, kind: input, shape index: {}]   ;;  %s2843_s8 = inlined_call_operand.vmem [shape: f32[128,8], index: 8, kind: input, shape index: {}]   ;;  %s2844_s9 = inlined_call_operand.vmem [shape: f32[8,128], index: 9, kind: input, shape index: {}]   ;;  %s2845_s10 = inlined_call_operand.vmem [shape: bf16[128,128], index: 10, kind: input, shape index: {}]   ;;  %s2846_s11 = inlined_call_operand.vmem [shape: bf16[224,128], index: 11, kind: input, shape index: {}]   ;;  %s2847_s12 = inlined_call_operand.vmem [shape: f32[2], index: 12, kind: input, shape index: {}]   ;;  %s2848_s13 = inlined_call_operand.hbm [shape: f32[2,16,128], index: 13, kind: output, shape index: {}]  }
   0x1   :  { %19 = vsyncpa [#allocation10], 0 }
   0x2   :  { %20 = vsyncpa [#allocation13], 0 }
   0x3   :  { %21 = vsyncpa [#allocation8], 0 }
   0x4   :  { %22 = vsyncpa [#allocation7], 0  ;;  %s2279_s25 = smov [#allocation9]   ;;  %s2280_s27 = smov [#allocation12]  }
   0x5   :  { %s40_s26 = sshll.u32 %s2279_s25, 4  ;;  %s67_s28 = sshll.u32 %s2280_s27, 4  ;;  %s41_s26 = int_to_ptr.vmem [resolvable:$true] %s40_s26  ;;  %s2371_s28 = int_to_ptr.vmem [resolvable:$true] %s67_s28 }
   0x6   :  { %s2125_s14 = scalar_lea.hbm %s2836_s1, 3072 }
   0x7   :  { %p2126_p0 = scmp.ne.s32.totalorder %s2836_s1, %s2125_s14  ;;  %p2129_p1 = scmp.lt.u32.totalorder %s2125_s14, %s2836_s1 }
   0x9   :  { %p2131_p2 = pnand %p2129_p1, %p2126_p0 }
   0xb   :  { %2134 = shalt.err (!%p2131_p2)
}
   0xc   :  { %s2135_s19 = scalar_lea.vmem %s41_s26, 3072  ;;  %p2140_p4 = scmp.lt.s32.totalorder %s41_s26, %s41_s26 }
   0xd   :  { %p2136_p3 = scmp.ne.s32.totalorder %s41_s26, %s2135_s19  ;;  %p2141_p5 = scmp.lt.s32.totalorder %s2135_s19, %s2135_s19 }
   0xf   :  { %p2142_p6 = por %p2141_p5, %p2140_p4 }
  0x11   :  { %p2143_p7 = pnand %p2142_p6, %p2136_p3 }
  0x13   :  { %2146 = shalt.err (!%p2143_p7)
}
  0x14   :  { %s2281_s20 = smov 64   ;;  %s2282_s21 = smov 4  }
  0x15   :  { %46 = dma.hbm_to_vmem [thread:$0]  %s2836_s1, 3072, %s41_s26, [#allocation10], %s2281_s20, %s2281_s20, %s2282_s21  }
  0x16   :  { %s2147_s27 = scalar_lea.hbm %s2840_s5, 16 }
  0x17   :  { %p2148_p8 = scmp.ne.s32.totalorder %s2840_s5, %s2147_s27  ;;  %p2151_p9 = scmp.lt.u32.totalorder %s2147_s27, %s2840_s5 }
  0x19   :  { %p2153_p10 = pnand %p2151_p9, %p2148_p8 }
  0x1b   :  { %2156 = shalt.err (!%p2153_p10)
}
  0x1c   :  { %s2157_s16 = scalar_lea.vmem %s2371_s28, 16  ;;  %s2161_s1 = scalar_lea.vmem %s2371_s28, 32 }
  0x1d   :  { %p2158_p11 = scmp.ne.s32.totalorder %s2371_s28, %s2157_s16  ;;  %p2162_p12 = scmp.lt.s32.totalorder %s2371_s28, %s2371_s28 }
  0x1e   :  { %p2163_p13 = scmp.lt.s32.totalorder %s2161_s1, %s2157_s16 }
  0x20   :  { %p2164_p0 = por %p2163_p13, %p2162_p12 }
  0x22   :  { %p2165_p1 = pnand %p2164_p0, %p2158_p11 }
  0x24   :  { %2168 = shalt.err (!%p2165_p1)
}
  0x25   :  { %70 = dma.hbm_to_vmem [thread:$0]  %s2840_s5, 16, %s2371_s28, [#allocation13]  }
  0x26   :  { %s2283_s18 = smov [#allocation5]   ;;  %s2284_s22 = smov [#allocation11]  }
  0x27   :  { %s28_s19 = sshll.u32 %s2283_s18, 4  ;;  %s55_s23 = sshll.u32 %s2284_s22, 4  ;;  %s29_s19 = int_to_ptr.vmem [resolvable:$true] %s28_s19  ;;  %s56_s23 = int_to_ptr.vmem [resolvable:$true] %s55_s23 }
  0x28   :  { %s2169_s27 = scalar_lea.hbm %s2835_s0, 256 }
  0x29   :  { %p2170_p2 = scmp.ne.s32.totalorder %s2835_s0, %s2169_s27  ;;  %p2173_p3 = scmp.lt.u32.totalorder %s2169_s27, %s2835_s0 }
  0x2b   :  { %p2175_p4 = pnand %p2173_p3, %p2170_p2 }
  0x2d   :  { %2178 = shalt.err (!%p2175_p4)
}
  0x2e   :  { %s2179_s5 = scalar_lea.vmem %s29_s19, 256  ;;  %p2184_p6 = scmp.lt.s32.totalorder %s29_s19, %s29_s19 }
  0x2f   :  { %p2180_p5 = scmp.ne.s32.totalorder %s29_s19, %s2179_s5  ;;  %p2185_p7 = scmp.lt.s32.totalorder %s2179_s5, %s2179_s5 }
  0x31   :  { %p2186_p8 = por %p2185_p7, %p2184_p6 }
  0x33   :  { %p2187_p9 = pnand %p2186_p8, %p2180_p5 }
  0x35   :  { %2190 = shalt.err (!%p2187_p9)
}
  0x36   :  { %34 = dma.hbm_to_vmem [thread:$0]  %s2835_s0, 256, %s29_s19, [#allocation6], %s2281_s20, %s2281_s20, %s2282_s21  }
  0x37   :  { %s2191_s17 = scalar_lea.hbm %s2838_s3, 16 }
  0x38   :  { %p2192_p10 = scmp.ne.s32.totalorder %s2838_s3, %s2191_s17  ;;  %p2195_p11 = scmp.lt.u32.totalorder %s2191_s17, %s2838_s3 }
  0x3a   :  { %p2197_p12 = pnand %p2195_p11, %p2192_p10 }
  0x3c   :  { %2200 = shalt.err (!%p2197_p12)
}
  0x3d   :  { %s2201_s27 = scalar_lea.vmem %s56_s23, 16  ;;  %s2205_s29 = scalar_lea.vmem %s56_s23, 32 }
  0x3e   :  { %p2202_p13 = scmp.ne.s32.totalorder %s56_s23, %s2201_s27  ;;  %p2206_p0 = scmp.lt.s32.totalorder %s56_s23, %s56_s23 }
  0x3f   :  { %p2207_p1 = scmp.lt.s32.totalorder %s2205_s29, %s2201_s27 }
  0x41   :  { %p2208_p2 = por %p2207_p1, %p2206_p0 }
  0x43   :  { %p2209_p3 = pnand %p2208_p2, %p2202_p13 }
  0x45   :  { %2212 = shalt.err (!%p2209_p3)
}
  0x46   :  { %58 = dma.hbm_to_vmem [thread:$0]  %s2838_s3, 16, %s56_s23, [#allocation10]  }
  0x47   :  { %s97_s14 = sshll.u32 %s2847_s12, 4  ;;  %s2285_s15 = smov [#allocation14]   ;;  %s98_s14 = int_to_ptr.vmem [resolvable:$true] %s97_s14 }
  0x48   :  { %s79_s5 = sshll.u32 %s2285_s15, 4  ;;  %s2213_s1 = scalar_lea.hbm %s2842_s7, 16  ;;  %s80_s5 = int_to_ptr.vmem [resolvable:$true] %s79_s5 }
  0x49   :  { %p2214_p4 = scmp.ne.s32.totalorder %s2842_s7, %s2213_s1  ;;  %p2217_p5 = scmp.lt.u32.totalorder %s2213_s1, %s2842_s7 }
  0x4b   :  { %p2219_p6 = pnand %p2217_p5, %p2214_p4 }
  0x4d   :  { %2222 = shalt.err (!%p2219_p6)
}
  0x4e   :  { %s2223_s3 = scalar_lea.vmem %s80_s5, 16  ;;  %s2227_s12 = scalar_lea.vmem %s80_s5, 32 }
  0x4f   :  { %p2224_p7 = scmp.ne.s32.totalorder %s80_s5, %s2223_s3  ;;  %p2228_p8 = scmp.lt.s32.totalorder %s80_s5, %s80_s5 }
  0x50   :  { %p2229_p9 = scmp.lt.s32.totalorder %s2227_s12, %s2223_s3 }
  0x52   :  { %p2230_p10 = por %p2229_p9, %p2228_p8 }
  0x54   :  { %p2231_p11 = pnand %p2230_p10, %p2224_p7 }
  0x56   :  { %2234 = shalt.err (!%p2231_p11)
}
  0x57   :  { %82 = dma.hbm_to_vmem [thread:$0]  %s2842_s7, 16, %s80_s5, [#allocation13]  }
  0x58   :  { %s2235_s25 = scalar_lea.vmem %s98_s14, 16  ;;  %p2240_p13 = scmp.lt.s32.totalorder %s98_s14, %s98_s14 }
  0x59   :  { %p2236_p12 = scmp.ne.s32.totalorder %s98_s14, %s2235_s25  ;;  %p2241_p0 = scmp.lt.s32.totalorder %s2235_s25, %s2235_s25 }
  0x5b   :  { %p2242_p1 = por %p2241_p0, %p2240_p13 }
  0x5d   :  { %p2243_p2 = pnand %p2242_p1, %p2236_p12 }
  0x5f   :  { %2246 = shalt.err (!%p2243_p2)
}
  0x60   :  { %s2286_s27 = smov [#allocation15]  }
  0x61   :  { %100 = dma.vmem_to_smem %s98_s14, 16, %s2286_s27, [#allocation8]  }
  0x62   :  { %2269 = dma.done.wait [#allocation6], 256  }
  0x63   :  { %2270 = vsyncadd [#allocation6], 4294967040 }
  0x64   :  { %2271 = dma.done.wait [#allocation10], 3088  }
  0x65   :  { %2272 = vsyncadd [#allocation10], 4294964208 }
  0x66   :  { %2273 = dma.done.wait [#allocation13], 32  }
  0x67   :  { %2274 = vsyncadd [#allocation13], 4294967264 }
  0x68   :  { %2275 = dma.done.wait [#allocation8], 16  }
  0x69   :  { %2276 = vsyncadd [#allocation8], 4294967280 }
  0x6a   :  { %119 = sfence }
  0x6b   :  { %v2055_v0 = vld [vmem:[#allocation9 + $0x40] sm:$0xff]   ;;  %v2287_v2 = vmov 0.0   ;;  %v2058_v4 = vld [vmem:[#allocation9 + $0x48] sm:$0xff]   ;;  %v2061_v7 = vld [vmem:[#allocation9 + $0x50] sm:$0xff]   ;;  %vm147_vm0 = vcmask 1040384   ;;  %vm166_vm1 = vcmask 1046528  }
  0x6c   :  { %v2056_v1 = vld [vmem:[#allocation9] sm:$0xff]   ;;  %141 = vst [vmem:[#allocation2] sm:$0x1] %v2287_v2  ;;  %142 = vst [vmem:[#allocation2 + $0x30] sm:$0x1] %v2287_v2  ;;  %1842 = vmatprep.subr.bf16.mxu0 %v2055_v0  ;;  %v2059_v5 = vld [vmem:[#allocation9 + $0x8] sm:$0xff]  }
  0x6d   :  { %181 = vst [vmem:[#allocation2 + $0x2f] sm:$0x1] %v2287_v2  ;;  %182 = vst [vmem:[#allocation2 + $0x5f] sm:$0x1] %v2287_v2  ;;  %v2057_v3 = vld [vmem:[#allocation9 + $0x80] sm:$0xff]   ;;  %1843 = vmatpush3.bf16.msra.mxu0 %v2056_v1  ;;  %v2060_v6 = vld [vmem:[#allocation9 + $0x88] sm:$0xff]  }
  0x6e   :  { %1913 = vmatprep.subr.bf16.mxu1 %v2057_v3  ;;  %1844 = vmatprep.subr.bf16.mxu0 %v2058_v4  ;;  %v2062_v8 = vld [vmem:[#allocation9 + $0x10] sm:$0xff]   ;;  %v2064_v10 = vld [vmem:[#allocation9 + $0x58] sm:$0xff]   ;;  %v2067_v13 = vld [vmem:[#allocation9 + $0x60] sm:$0xff]   ;;  %s2288_s7 = smov 8   ;;  %s2289_s29 = smov 16   ;;  %vm602_vm6 = vcmask 1041409  }
  0x6f   :  { %1914 = vmatpush3.bf16.msra.mxu1 %v2057_v3  ;;  %v2063_v9 = vld [vmem:[#allocation9 + $0x90] sm:$0xff]   ;;  %v2065_v11 = vld [vmem:[#allocation9 + $0x18] sm:$0xff]   ;;  %v2069_v14 = vld [vmem:[#allocation9 + $0xa0] sm:$0xff]   ;;  %s2290_s0 = smov 32   ;;  %vm2292_vm7 = vmmov 0   ;;  %vm664_vm8 = vcmask 1043459  }
  0x70   :  { %1915 = vmatprep.subr.bf16.mxu1 %v2060_v6  ;;  %v2066_v12 = vld [vmem:[#allocation9 + $0x98] sm:$0xff]   ;;  %v2068_v15 = vld [vmem:[#allocation9 + $0x20] sm:$0xff]   ;;  %v2070_v16 = vld [vmem:[#allocation9 + $0x68] sm:$0xff]   ;;  %vm667_vm9 = vcmask 1041408   ;;  %vm763_vm10 = vcmask 64512   ;;  %vm846_vm11 = vcmask 15360  }
  0x71   :  { %1845 = vmatpush3.bf16.msra.mxu0 %v2059_v5  ;;  %v2072_v17 = vld [vmem:[#allocation9 + $0xa8] sm:$0xff]   ;;  %v2073_v19 = vld [vmem:[#allocation9 + $0x70] sm:$0xff]   ;;  %v2076_v22 = vld [vmem:[#allocation9 + $0x78] sm:$0xff]   ;;  %s2295_s18 = smov 96   ;;  %s2296_s22 = smov 80   ;;  %vm1328_vm12 = vcmask 256000  }
  0x72   :  { %1846 = vmatprep.subr.bf16.mxu0 %v2061_v7  ;;  %v2071_v18 = vld [vmem:[#allocation9 + $0x28] sm:$0xff]   ;;  %v2074_v20 = vld [vmem:[#allocation9 + $0x30] sm:$0xff]   ;;  %v2078_v23 = vld [vmem:[#allocation9 + $0xb8] sm:$0xff]   ;;  %1330 = vst.msk [vmem:[#allocation3 + $0x18] sm:$0x7] %vm1328_vm12, %v2287_v2  ;;  %vm1323_vm13 = vcmask 130048  }
  0x73   :  { %1916 = vmatpush3.bf16.msra.mxu1 %v2060_v6  ;;  %v2075_v21 = vld [vmem:[#allocation9 + $0xb0] sm:$0xff]   ;;  %v1841_v25 = vld [vmem:[#allocation5 + $0x8] sm:$0xff]   ;;  %1329 = vst.msk [vmem:[#allocation3] sm:$0x7] %vm1328_vm12, %v2287_v2  ;;  %1331 = vst.msk [vmem:[#allocation3 + $0x13] sm:$0x7] %vm1328_vm12, %v2287_v2 }
  0x74   :  { %1917 = vmatprep.subr.bf16.mxu1 %v2063_v9  ;;  %v1834_v24 = vld [vmem:[#allocation5] sm:$0xff]   ;;  %v2077_v26 = vld [vmem:[#allocation9 + $0x38] sm:$0xff]   ;;  %v1839_v29 = vunpack.c.l.bf16 %v1841_v25  ;;  %v1840_v30 = vunpack.c.h.bf16 %v1841_v25  ;;  %1332 = vst.msk [vmem:[#allocation3 + $0x2b] sm:$0x7] %vm1328_vm12, %v2287_v2  ;;  %vm1333_vm14 = vcmask 261120   ;;  %vm1366_vm15 = vcmask 523520  }
  0x75   :  { %1847 = vmatpush3.bf16.msra.mxu0 %v2062_v8  ;;  %v1835_v27 = vunpack.c.l.bf16 %v1834_v24  ;;  %v1836_v28 = vunpack.c.h.bf16 %v1834_v24  ;;  %s2299_s21 = smov [#allocation16]  }
  0x76   :  { %1848 = vmatprep.subr.bf16.mxu0 %v2064_v10  ;;  %vm131_vm4 = vcmp.ge.f32.partialorder %v1839_v29, 0.0  ;;  %vm132_vm5 = vcmp.ge.f32.partialorder %v1840_v30, 0.0  ;;  %v135_v33 = vmul.f32 0.2, %v1839_v29  ;;  %v136_v34 = vmul.f32 0.2, %v1840_v30 }
  0x77   :  { %1918 = vmatpush3.bf16.msra.mxu1 %v2063_v9  ;;  %vm129_vm2 = vcmp.ge.f32.partialorder %v1835_v27, 0.0  ;;  %vm130_vm3 = vcmp.ge.f32.partialorder %v1836_v28, 0.0  ;;  %v133_v31 = vmul.f32 0.2, %v1835_v27  ;;  %v134_v32 = vmul.f32 0.2, %v1836_v28 }
  0x78   :  { %1919 = vmatprep.subr.bf16.mxu1 %v2066_v12  ;;  %v139_v42 = vsel %vm131_vm4, %v1839_v29, %v135_v33  ;;  %v140_v43 = vsel %vm132_vm5, %v1840_v30, %v136_v34 }
  0x79   :  { %1849 = vmatpush3.bf16.msra.mxu0 %v2065_v11  ;;  %v137_v35 = vsel %vm129_vm2, %v1835_v27, %v133_v31  ;;  %v138_v36 = vsel %vm130_vm3, %v1836_v28, %v134_v32  ;;  %v170_v45 = vrot.slane %v139_v42, 1  ;;  %v171_v46 = vrot.slane %v140_v43, 1 }
  0x7a   :  { %1850 = vmatprep.subr.bf16.mxu0 %v2067_v13  ;;  %v148_v37 = vrot.slane %v137_v35, 7  ;;  %v149_v38 = vrot.slane %v138_v36, 7  ;;  %v167_v39 = vrot.slane %v137_v35, 1  ;;  %v196_v40 = vpack.c.bf16 %v138_v36, %v137_v35 }
  0x7b   :  { %1920 = vmatpush3.bf16.msra.mxu1 %v2066_v12  ;;  %v168_v41 = vrot.slane %v138_v36, 1  ;;  %v151_v48 = vrot.slane %v139_v42, 7  ;;  %v152_v49 = vrot.slane %v140_v43, 7  ;;  %v172_v50 = vsel %vm166_vm1, %v170_v45, %v171_v46  ;;  %180 = vst [vmem:[#allocation2 + $0x58] sm:$0x7f] %v171_v46 }
  0x7c   :  { %1921 = vmatprep.subr.bf16.mxu1 %v2069_v14  ;;  %425 = vmatprep.mubr.bf16.mxu0 %v196_v40  ;;  %158 = vst [vmem:[#allocation2] sm:$0xfe] %v148_v37  ;;  %v150_v44 = vsel %vm147_vm0, %v148_v37, %v149_v38  ;;  %v199_v53 = vpack.c.bf16 %v140_v43, %v139_v42  ;;  %vm1601_vm2 = vcmask 785408  }
  0x7d   :  { %1851 = vmatpush3.bf16.msra.mxu0 %v2068_v15  ;;  %v169_v47 = vsel %vm166_vm1, %v167_v39, %v168_v41  ;;  %178 = vst [vmem:[#allocation2 + $0x28] sm:$0x7f] %v168_v41  ;;  %v153_v51 = vsel %vm147_vm0, %v151_v48, %v152_v49  ;;  %160 = vst [vmem:[#allocation2 + $0x30] sm:$0xfe] %v151_v48  ;;  %vm1416_vm1 = vcmask 1048320  }
  0x7e   :  { %1852 = vmatprep.subr.bf16.mxu0 %v2070_v16 }
  0x7f   :  { %1922 = vmatpush3.bf16.msra.mxu1 %v2069_v14 }
  0x80   :  { %1923 = vmatprep.subr.bf16.mxu1 %v2072_v17 }
  0x81   :  { %1853 = vmatpush3.bf16.msra.mxu0 %v2071_v18 }
  0x82   :  { %1854 = vmatprep.subr.bf16.mxu0 %v2073_v19  ;;  %v194_v57 = vld [vmem:[#allocation2 + $0x58] sm:$0xff] }
  0x83   :  { %1924 = vmatpush3.bf16.msra.mxu1 %v2072_v17  ;;  %v183_v52 = vld [vmem:[#allocation2] sm:$0xff]  ;;  %v200_v58 = vpack.c.bf16 %v194_v57, %v172_v50 }
  0x84   :  { %1925 = vmatprep.subr.bf16.mxu1 %v2075_v21  ;;  %v195_v54 = vpack.c.bf16 %v150_v44, %v183_v52  ;;  %v188_v55 = vld [vmem:[#allocation2 + $0x28] sm:$0xff]  ;;  %v189_v59 = vld [vmem:[#allocation2 + $0x30] sm:$0xff] }
  0x85   :  { %1855 = vmatpush3.bf16.msra.mxu0 %v2074_v20  ;;  %v197_v56 = vpack.c.bf16 %v188_v55, %v169_v47  ;;  %v198_v60 = vpack.c.bf16 %v153_v51, %v189_v59  ;;  %v534_v51 = vlaneseq }
  0x86   :  { %1856 = vmatprep.subr.bf16.mxu0 %v2076_v22 }
  0x87   :  { %1926 = vmatpush3.bf16.msra.mxu1 %v2075_v21  ;;  %1929 = vmatprep.mubr.bf16.mxu1 %v197_v56 }
  0x88   :  { %1927 = vmatprep.subr.bf16.mxu1 %v2078_v23 }
  0x89   :  { %1857 = vmatpush3.bf16.msra.mxu0 %v2077_v26 }
  0x8b   :  { %1928 = vmatpush3.bf16.msra.mxu1 %v2078_v23 }
  0x8c   :  { %426 = vmatmul.mubr.bf16.vlgmr.msra.gmra.mrb[0].mxu0 %v195_v54  ;;  %v2471_v54 = vshrl.u32 %v534_v51, 7 }
  0x8d   :  { %433 = vmatprep.mubr.bf16.mxu0 %v199_v53 }
  0x8e   :  { %1930 = vmatmul.mubr.bf16.vlgmr.msra.gmra.mrb[0].mxu1 %v200_v58  ;;  %v2474_v56 = vsub.s32 0, %v2471_v54  ;;  %v544_v58 = vsub.s32 1, %v2471_v54 }
  0x8f   :  { %1965 = vmatprep.mubr.msk.f32.mxu1 %vm2292_vm7, %v2287_v2 }
  0x94   :  { %434 = vmatmul.mubr.bf16.gmra.mrb[4].mxu0 %v198_v60 }
 0x15f   :  { %v1858_v61 = vpop.f32.mrb[0].mxu0 }
 0x160   :  { %v1859_v62 = vpop.f32.mrb[1].mxu0 }
 0x161   :  { %v1860_v63 = vadd.f32 %v1859_v62, %v1858_v61  ;;  %v1861_v0 = vpop.f32.mrb[2].mxu0  ;;  %v1931_v1 = vpop.f32.mrb[0].mxu1 }
 0x162   :  { %v1862_v3 = vpop.f32.mrb[3].mxu0  ;;  %v476_v4 = vpop.f32.mrb[1].mxu1 }
 0x163   :  { %v1863_v5 = vadd.f32 %v1862_v3, %v1861_v0  ;;  %v2456_v6 = vadd.f32 %v1860_v63, %v476_v4  ;;  %v1932_v7 = vpop.f32.mrb[2].mxu1 }
 0x164   :  { %v479_v8 = vpop.f32.mrb[3].mxu1 }
 0x165   :  { %v2458_v9 = vadd.f32 %v1863_v5, %v479_v8  ;;  %v500_v16 = vmul.f32 %v2456_v6, %v2456_v6  ;;  %v1796_v8 = vld [vmem:[#allocation11] ss:$0 sm:$0xff] }
 0x167   :  { %v1864_v10 = vpop.f32.mrb[4].mxu0  ;;  %v501_v12 = vmul.f32 %v2458_v9, %v2458_v9  ;;  %v491_v17 = vadd.f32 %v2458_v9, %v2456_v6 }
 0x168   :  { %v1865_v11 = vpop.f32.mrb[5].mxu0 }
 0x169   :  { %v1866_v13 = vadd.f32 %v1865_v11, %v1864_v10  ;;  %v1867_v14 = vpop.f32.mrb[6].mxu0  ;;  %v504_v20 = vadd.f32 %v501_v12, %v500_v16 }
 0x16a   :  { %v1868_v15 = vpop.f32.mrb[7].mxu0 }
 0x16b   :  { %v485_v18 = vadd.f32 %v1931_v1, %v1866_v13  ;;  %v1869_v19 = vadd.f32 %v1868_v15, %v1867_v14  ;;  %v1795_v1 = vld [vmem:[%s2837_s2] ss:$0 sm:$0xff] }
 0x16d   :  { %v492_v21 = vadd.f32 %v491_v17, %v485_v18  ;;  %v502_v22 = vmul.f32 %v485_v18, %v485_v18  ;;  %v488_v23 = vadd.f32 %v1932_v7, %v1869_v19 }
 0x16f   :  { %v505_v24 = vadd.f32 %v504_v20, %v502_v22  ;;  %v493_v25 = vadd.f32 %v492_v21, %v488_v23  ;;  %v503_v26 = vmul.f32 %v488_v23, %v488_v23 }
 0x171   :  { %v494_v27 = vrot.slane %v493_v25, 4  ;;  %v506_v28 = vadd.f32 %v505_v24, %v503_v26 }
 0x173   :  { %v495_v29 = vadd.f32 %v494_v27, %v493_v25  ;;  %v507_v30 = vrot.slane %v506_v28, 4 }
 0x175   :  { %v496_v31 = vrot.slane %v495_v29, 2  ;;  %v508_v32 = vadd.f32 %v507_v30, %v506_v28 }
 0x177   :  { %v497_v33 = vadd.f32 %v496_v31, %v495_v29  ;;  %v509_v34 = vrot.slane %v508_v32, 2 }
 0x179   :  { %v498_v35 = vrot.slane %v497_v33, 1  ;;  %v510_v36 = vadd.f32 %v509_v34, %v508_v32 }
 0x17b   :  { %v511_v37 = vrot.slane %v510_v36, 1  ;;  %v499_v38 = vadd.f32 %v498_v35, %v497_v33 }
 0x17d   :  { %v512_v39 = vadd.f32 %v511_v37, %v510_v36 }
 0x17f   :  { %v513_v40 = vsel %vm147_vm0, %v499_v38, %v512_v39  ;;  %v669_v39 = vld [vmem:[%s2843_s8] sm:$0xff]  ;;  %vm1391_vm0 = vcmask 785920  }
 0x180   :  { %514 = vrot.lane.b32.xlu0 %v513_v40, %s2288_s7 }
 0x1f2   :  { %v515_v41 = vpop.permute.xlu0 %514 }
 0x1f3   :  { %v516_v42 = vadd.f32 %v515_v41, %v513_v40  ;;  %v670_v40 = vld [vmem:[%s2843_s8 + $0x8] sm:$0xff]  ;;  %v671_v41 = vld [vmem:[%s2843_s8 + $0x10] sm:$0xff] }
 0x1f5   :  { %517 = vrot.lane.b32.xlu0 %v516_v42, %s2289_s29 }
 0x267   :  { %v518_v43 = vpop.permute.xlu0 %517 }
 0x268   :  { %v519_v44 = vadd.f32 %v518_v43, %v516_v42  ;;  %v2291_v43 = vmov 0.0|0.0  }
 0x269   :  { %2003 = vmatprep.subr.bf16.mxu1 %v2291_v43 }
 0x26a   :  { %520 = vrot.lane.b32.xlu1 %v519_v44, %s2290_s0 }
 0x2dc   :  { %v521_v45 = vpop.permute.xlu1 %520 }
 0x2dd   :  { %v522_v46 = vadd.f32 %v521_v45, %v519_v44  ;;  %v2004_v44 = vpack.c.bf16 %v670_v40, %v669_v39  ;;  %v672_v45 = vld [vmem:[%s2843_s8 + $0x18] sm:$0xff] }
 0x2df   :  { %523 = vrot.lane.b32.xlu1 %v522_v46, %s2281_s20  ;;  %2005 = vmatpush3.bf16.msra.mxu1 %v2004_v44 }
 0x2e0   :  { %2006 = vmatprep.subr.bf16.mxu1 %v2291_v43 }
 0x351   :  { %v524_v47 = vpop.permute.xlu1 %523 }
 0x352   :  { %v525_v48 = vadd.f32 %v524_v47, %v522_v46 }
 0x354   :  { %v526_v49 = vmul.f32 0.001953125, %v525_v48  ;;  %v2007_v48 = vpack.c.bf16 %v672_v45, %v671_v41 }
 0x356   :  { %v527_v50 = vmul.f32 %v526_v49, %v526_v49  ;;  %v537_v57 = vrot.slane %v526_v49, %v2474_v56  ;;  %2008 = vmatpush3.bf16.msra.mxu1 %v2007_v48  ;;  %v1797_v48 = vld [vmem:[#allocation12] ss:$0 sm:$0xff] }
 0x357   :  { %2009 = vmatprep.subr.bf16.mxu1 %v2291_v43 }
 0x358   :  { %v529_v52 = vrot.slane %v527_v50, 7  ;;  %v538_v60 = vsub.f32 %v2456_v6, %v537_v57  ;;  %v539_v61 = vsub.f32 %v2458_v9, %v537_v57  ;;  %v540_v62 = vsub.f32 %v485_v18, %v537_v57  ;;  %v674_v50 = vld [vmem:[%s2843_s8 + $0x28] sm:$0xff] }
 0x359   :  { %v541_v63 = vsub.f32 %v488_v23, %v537_v57 }
 0x35a   :  { %v531_v53 = vsub.f32 %v526_v49, %v529_v52  ;;  %v673_v49 = vld [vmem:[%s2843_s8 + $0x20] sm:$0xff] }
 0x35b   :  { %v2010_v52 = vpack.c.bf16 %v674_v50, %v673_v49 }
 0x35c   :  { %v532_v55 = vadd.f32 1e-05, %v531_v53  ;;  %v675_v53 = vld [vmem:[%s2843_s8 + $0x30] sm:$0xff] }
 0x35d   :  { %2011 = vmatpush3.bf16.msra.mxu1 %v2010_v52 }
 0x35e   :  { %2101 = vrsqrt.f32 %v532_v55  ;;  %v676_v55 = vld [vmem:[%s2843_s8 + $0x38] sm:$0xff]  ;;  %2012 = vmatprep.subr.bf16.mxu1 %v2291_v43 }
 0x35f   :  { %v2013_v57 = vpack.c.bf16 %v676_v55, %v675_v53  ;;  %v933_v53 = vld [vmem:[%s2844_s9] sm:$0xff]  ;;  %s1756_s9 = sshll.u32 %s2299_s21, 4  ;;  %s1757_s9 = int_to_ptr.vmem [resolvable:$true] %s1756_s9 }
 0x360   :  { %v2079_v55 = vld [vmem:[%s2845_s10] sm:$0xff]   ;;  %s2247_s19 = scalar_lea.vmem %s1757_s9, 512  ;;  %p2252_p4 = scmp.lt.s32.totalorder %s1757_s9, %s1757_s9 }
 0x361   :  { %2014 = vmatpush3.bf16.msra.mxu1 %v2013_v57  ;;  %v1799_v57 = vld [vmem:[#allocation14] ss:$0 sm:$0xff]  ;;  %p2248_p3 = scmp.ne.s32.totalorder %s1757_s9, %s2247_s19  ;;  %p2253_p5 = scmp.lt.s32.totalorder %s2247_s19, %s2247_s19 }
 0x362   :  { %2015 = vmatprep.subr.bf16.mxu1 %v2291_v43 }
 0x363   :  { %p2254_p6 = por %p2253_p5, %p2252_p4 }
 0x365   :  { %p2255_p7 = pnand %p2254_p6, %p2248_p3 }
 0x368   :  { %v2102_v59 = vpop.eup %2101 }
 0x369   :  { %v545_v0 = vrot.slane %v2102_v59, %v544_v58  ;;  %v677_v58 = vld [vmem:[%s2843_s8 + $0x40] sm:$0xff]  ;;  %v678_v59 = vld [vmem:[%s2843_s8 + $0x48] sm:$0xff] }
 0x36b   :  { %v546_v3 = vmul.f32 %v545_v0, %v538_v60  ;;  %v547_v4 = vmul.f32 %v545_v0, %v539_v61  ;;  %v548_v5 = vmul.f32 %v545_v0, %v540_v62  ;;  %v549_v7 = vmul.f32 %v545_v0, %v541_v63  ;;  %v679_v61 = vld [vmem:[%s2843_s8 + $0x50] sm:$0xff]  ;;  %v680_v62 = vld [vmem:[%s2843_s8 + $0x58] sm:$0xff]  ;;  %v681_v0 = vld [vmem:[%s2843_s8 + $0x60] sm:$0xff] }
 0x36c   :  { %v2016_v60 = vpack.c.bf16 %v678_v59, %v677_v58  ;;  %v2019_v63 = vpack.c.bf16 %v680_v62, %v679_v61 }
 0x36d   :  { %v557_v10 = vmul.f32 %v1795_v1, %v546_v3  ;;  %v558_v11 = vmul.f32 %v1795_v1, %v547_v4  ;;  %v559_v12 = vmul.f32 %v1795_v1, %v548_v5  ;;  %v560_v13 = vmul.f32 %v1795_v1, %v549_v7  ;;  %v682_v1 = vld [vmem:[%s2843_s8 + $0x68] sm:$0xff]  ;;  %v683_v5 = vld [vmem:[%s2843_s8 + $0x70] sm:$0xff]  ;;  %v684_v7 = vld [vmem:[%s2843_s8 + $0x78] sm:$0xff]  ;;  %s2297_s8 = smov 48  }
 0x36e   :  { %2017 = vmatpush3.bf16.msra.mxu1 %v2016_v60  ;;  %v2022_v3 = vpack.c.bf16 %v682_v1, %v681_v0 }
 0x36f   :  { %v2483_v14 = vadd.f32 %v1796_v8, %v557_v10  ;;  %v2485_v6 = vadd.f32 %v1796_v8, %v558_v11  ;;  %v2487_v9 = vadd.f32 %v1796_v8, %v559_v12  ;;  %v2489_v15 = vadd.f32 %v1796_v8, %v560_v13  ;;  %2018 = vmatprep.subr.bf16.mxu1 %v2291_v43 }
 0x370   :  { %v2025_v10 = vpack.c.bf16 %v684_v7, %v683_v5  ;;  %v2081_v5 = vld [vmem:[%s2845_s10 + $0x10] sm:$0xff]   ;;  %v2082_v7 = vld [vmem:[%s2845_s10 + $0x18] sm:$0xff]  }
 0x371   :  { %v586_v16 = vmax.f32 %v2483_v14, %v2485_v6  ;;  %v593_v17 = vmax.f32 %v2487_v9, %v2489_v15 }
 0x372   :  { %2020 = vmatpush3.bf16.msra.mxu1 %v2019_v63 }
 0x373   :  { %v587_v18 = vrot.slane %v586_v16, 4  ;;  %v594_v19 = vrot.slane %v593_v17, 4  ;;  %2021 = vmatprep.subr.bf16.mxu1 %v2291_v43 }
 0x375   :  { %v588_v20 = vmax.f32 %v586_v16, %v587_v18  ;;  %v595_v21 = vmax.f32 %v593_v17, %v594_v19  ;;  %v572_v17 = vadd.f32 %v2485_v6, %v2483_v14  ;;  %v579_v18 = vadd.f32 %v2489_v15, %v2487_v9 }
 0x376   :  { %2023 = vmatpush3.bf16.msra.mxu1 %v2022_v3  ;;  %v2080_v3 = vld [vmem:[%s2845_s10 + $0x8] sm:$0xff]  }
 0x377   :  { %v589_v22 = vrot.slane %v588_v20, 2  ;;  %v596_v23 = vrot.slane %v595_v21, 2  ;;  %2024 = vmatprep.subr.bf16.mxu1 %v2291_v43  ;;  %v573_v19 = vrot.slane %v572_v17, 4  ;;  %v755_v43 = vld [vmem:[%s2839_s4] sm:$0xff] }
 0x379   :  { %v590_v24 = vmax.f32 %v588_v20, %v589_v22  ;;  %v597_v25 = vmax.f32 %v595_v21, %v596_v23  ;;  %v580_v20 = vrot.slane %v579_v18, 4  ;;  %v574_v21 = vadd.f32 %v573_v19, %v572_v17 }
 0x37a   :  { %2026 = vmatpush3.bf16.msra.mxu1 %v2025_v10  ;;  %v2084_v10 = vld [vmem:[%s2845_s10 + $0x28] sm:$0xff]  }
 0x37b   :  { %v591_v26 = vrot.slane %v590_v24, 1  ;;  %v598_v27 = vrot.slane %v597_v25, 1  ;;  %1968 = vmatprep.subr.mxu1 %v2287_v2  ;;  %v581_v22 = vadd.f32 %v580_v20, %v579_v18  ;;  %v575_v23 = vrot.slane %v574_v21, 2 }
 0x37d   :  { %v592_v28 = vmax.f32 %v590_v24, %v591_v26  ;;  %v599_v29 = vmax.f32 %v597_v25, %v598_v27  ;;  %v582_v24 = vrot.slane %v581_v22, 2  ;;  %v576_v25 = vadd.f32 %v575_v23, %v574_v21 }
 0x37f   :  { %v603_v30 = vsel %vm602_vm6, %v599_v29, %v592_v28  ;;  %v583_v26 = vadd.f32 %v582_v24, %v581_v22  ;;  %v577_v27 = vrot.slane %v576_v25, 1 }
 0x380   :  { %605 = vrot.lane.b32.xlu0 %v603_v30, %s2288_s7 }
 0x3f2   :  { %v606_v31 = vpop.permute.xlu0 %605 }
 0x3f3   :  { %v608_v32 = vrot.slane %v606_v31, 1  ;;  %v611_v34 = vmax.f32 %v592_v28, %v606_v31  ;;  %v584_v28 = vrot.slane %v583_v26, 1 }
 0x3f5   :  { %v612_v33 = vmax.f32 %v599_v29, %v608_v32  ;;  %v578_v32 = vadd.f32 %v577_v27, %v576_v25 }
 0x3f7   :  { %v615_v35 = vrot.slane %v612_v33, 7 }
 0x3f9   :  { %v616_v36 = vsel %vm602_vm6, %v615_v35, %v611_v34 }
 0x3fa   :  { %618 = vrot.lane.b32.xlu1 %v616_v36, %s2289_s29 }
 0x46c   :  { %v619_v37 = vpop.permute.xlu1 %618 }
 0x46d   :  { %v621_v38 = vrot.slane %v619_v37, 1  ;;  %v624_v46 = vmax.f32 %v611_v34, %v619_v37  ;;  %v652_v37 = vmul.f32 0.00390625, %v578_v32 }
 0x46f   :  { %v625_v42 = vmax.f32 %v612_v33, %v621_v38  ;;  %v585_v33 = vadd.f32 %v584_v28, %v583_v26 }
 0x471   :  { %v628_v47 = vrot.slane %v625_v42, 7  ;;  %v653_v38 = vmul.f32 0.00390625, %v585_v33 }
 0x473   :  { %v629_v51 = vsel %vm602_vm6, %v628_v47, %v624_v46  ;;  %v658_v41 = vsel %vm602_vm6, %v653_v38, %v652_v37  ;;  %v838_v47 = vld [vmem:[%s2841_s6] sm:$0x3]  ;;  %s1828_s6 = sld [smem:[#allocation15 + $0x1]] }
 0x474   :  { %631 = vrot.lane.b32.xlu0 %v629_v51, %s2290_s0 }
 0x4e6   :  { %v632_v4 = vpop.permute.xlu0 %631 }
 0x4e7   :  { %v634_v8 = vrot.slane %v632_v4, 1  ;;  %v637_v12 = vmax.f32 %v624_v46, %v632_v4 }
 0x4e9   :  { %v638_v11 = vmax.f32 %v625_v42, %v634_v8  ;;  %v2083_v8 = vld [vmem:[%s2845_s10 + $0x20] sm:$0xff]  }
 0x4eb   :  { %v641_v13 = vrot.slane %v638_v11, 7 }
 0x4ed   :  { %v642_v16 = vsel %vm602_vm6, %v641_v13, %v637_v12  ;;  %v2293_v13 = vmov 1966171168  }
 0x4ee   :  { %644 = vrot.lane.b32.xlu1 %v642_v16, %s2281_s20  ;;  %v1009_v16 = vunpack.c.l.s4 %v2293_v13 }
 0x4f0   :  { %v1010_v17 = vunpack.c.0.s8 %v1009_v16 }
 0x4f2   :  { %v1013_v18 = vsub.s32 %v1010_v17, %v2471_v54 }
 0x560   :  { %v645_v29 = vpop.permute.xlu1 %644 }
 0x561   :  { %v647_v30 = vrot.slane %v645_v29, 1  ;;  %v650_v31 = vmax.f32 %v637_v12, %v645_v29  ;;  %v2086_v12 = vld [vmem:[%s2845_s10 + $0x38] sm:$0xff]  }
 0x563   :  { %v651_v34 = vmax.f32 %v638_v11, %v647_v30  ;;  %v654_v35 = vmul.f32 0.0625, %v650_v31  ;;  %v2085_v11 = vld [vmem:[%s2845_s10 + $0x30] sm:$0xff]   ;;  %s2294_s10 = smov 112  }
 0x565   :  { %v655_v36 = vmul.f32 0.0625, %v651_v34  ;;  %v662_v39 = vrot.slane %v654_v35, 6 }
 0x567   :  { %v663_v40 = vrot.slane %v655_v36, 5 }
 0x569   :  { %v665_v42 = vsel %vm664_vm8, %v663_v40, %v662_v39 }
 0x56a   :  { %v668_v44 = vsel %vm667_vm9, %v658_v41, %v665_v42 }
 0x56b   :  { %1966 = vmatmul.mubr.f32.vlgmr.msra.gmra.mrb[4].mxu1 %v668_v44 }
 0x56c   :  { %1969 = vmatpush3.msra.mxu1 %v755_v43  ;;  %1970 = vmatprep.mubr.msk.f32.mxu1 %vm2292_vm7, %v2287_v2 }
 0x56d   :  { %1973 = vmatprep.subr.mxu1 %v2287_v2 }
 0x63e   :  { %v751_v45 = vpop.f32.mrb[4].mxu1 }
 0x63f   :  { %v1967_v46 = vpop.f32.mrb[5].mxu1  ;;  %1971 = vmatmul.mubr.msk.f32.vlgmr.msra.gmra.mrb[6].mxu1 %vm763_vm10, %v751_v45 }
 0x640   :  { %1975 = vmatprep.mubr.msk.f32.mxu1 %vm2292_vm7, %v2287_v2  ;;  %1974 = vmatpush3.msk.msra.mxu1 %vm667_vm9, %v838_v47 }
 0x641   :  { %1978 = vmatprep.subr.mxu1 %v2287_v2 }
 0x712   :  { %v833_v49 = vpop.f32.mrb[6].mxu1 }
 0x713   :  { %v834_v50 = vadd.f32 %v1797_v48, %v833_v49  ;;  %v1972_v51 = vpop.f32.mrb[7].mxu1 }
 0x715   :  { %v837_v52 = vmax.f32 %v834_v50, 0.0 }
 0x717   :  { %1976 = vmatmul.mubr.msk.f32.vlgmr.msra.gmra.mrb[8].mxu1 %vm846_vm11, %v837_v52 }
 0x718   :  { %1980 = vmatprep.mubr.msk.f32.mxu1 %vm2292_vm7, %v2287_v2  ;;  %1979 = vmatpush3.msra.mxu1 %v933_v53 }
 0x719   :  { %1983 = vmatprep.subr.bf16.mxu1 %v2079_v55 }
 0x7ea   :  { %v919_v58 = vpop.f32.mrb[8].mxu1 }
 0x7eb   :  { %v920_v59 = vadd.f32 %v1799_v57, %v919_v58  ;;  %v1977_v60 = vpop.f32.mrb[9].mxu1 }
 0x7ed   :  { %v924_v61 = vrot.slane %v920_v59, 2 }
 0x7ef   :  { %v926_v62 = vadd.f32 %v924_v61, %v920_v59 }
 0x7f1   :  { %v1802_v63 = vmul.f32 -1.442695, %v926_v62 }
 0x7f3   :  { %2103 = vpow2.f32 %v1802_v63 }
 0x7fd   :  { %v2104_v0 = vpop.eup %2103 }
 0x7fe   :  { %v930_v1 = vadd.f32 1.0, %v2104_v0 }
 0x800   :  { %2105 = vrcp.f32 %v930_v1 }
 0x80a   :  { %v2106_v4 = vpop.eup %2105 }
 0x80b   :  { %1981 = vmatmul.mubr.msk.f32.vlgmr.msra.gmra.mrb[10].mxu1 %vm763_vm10, %v2106_v4 }
 0x80c   :  { %1984 = vmatpush3.bf16.msra.mxu1 %v2079_v55 }
 0x80d   :  { %1985 = vmatprep.subr.bf16.mxu1 %v2080_v3 }
 0x810   :  { %1986 = vmatpush3.bf16.msra.mxu1 %v2080_v3 }
 0x811   :  { %1987 = vmatprep.subr.bf16.mxu1 %v2081_v5 }
 0x814   :  { %1988 = vmatpush3.bf16.msra.mxu1 %v2081_v5 }
 0x815   :  { %1989 = vmatprep.subr.bf16.mxu1 %v2082_v7 }
 0x818   :  { %1990 = vmatpush3.bf16.msra.mxu1 %v2082_v7 }
 0x819   :  { %1991 = vmatprep.subr.bf16.mxu1 %v2083_v8 }
 0x81c   :  { %1992 = vmatpush3.bf16.msra.mxu1 %v2083_v8 }
 0x81d   :  { %1993 = vmatprep.subr.bf16.mxu1 %v2084_v10 }
 0x820   :  { %1994 = vmatpush3.bf16.msra.mxu1 %v2084_v10 }
 0x821   :  { %1995 = vmatprep.subr.bf16.mxu1 %v2085_v11 }
 0x824   :  { %1996 = vmatpush3.bf16.msra.mxu1 %v2085_v11 }
 0x825   :  { %1997 = vmatprep.subr.bf16.mxu1 %v2086_v12 }
 0x828   :  { %1998 = vmatpush3.bf16.msra.mxu1 %v2086_v12 }
 0x8de   :  { %v1003_v19 = vpop.f32.mrb[10].mxu1 }
 0x8df   :  { %v1014_v20 = vrot.slane %v1003_v19, %v1013_v18  ;;  %v1982_v21 = vpop.f32.mrb[11].mxu1 }
 0x8e1   :  { %v1015_v22 = vcombine.high %v1014_v20, %v1014_v20  ;;  %v1022_v23 = vrot.slane %v1014_v20, %v1013_v18 }
 0x8e3   :  { %v1029_v24 = vrot.slane %v1015_v22, %v1013_v18  ;;  %v1033_v25 = vrot.slane %v1022_v23, %v2474_v56 }
 0x8e5   :  { %v1037_v26 = vrot.slane %v1029_v24, %v2474_v56  ;;  %v2606_v27 = vmul.f32 %v1033_v25, %v2483_v14  ;;  %v2609_v28 = vmul.f32 %v1033_v25, %v2485_v6 }
 0x8e7   :  { %v2612_v29 = vmul.f32 %v1037_v26, %v2487_v9  ;;  %v2615_v54 = vmul.f32 %v1037_v26, %v2489_v15  ;;  %v1044_v30 = vpack.c.bf16 %v2609_v28, %v2606_v27 }
 0x8e9   :  { %1999 = vmatprep.mubr.bf16.mxu1 %v1044_v30  ;;  %v1045_v31 = vpack.c.bf16 %v2615_v54, %v2612_v29 }
 0x8eb   :  { %2000 = vmatmul.mubr.bf16.vlgmr.msra.gmra.mrb[12].mxu1 %v1045_v31 }
 0x9be   :  { %v2621_v56 = vpop.f32.mrb[12].mxu1 }
 0x9bf   :  { %1167 = vrot.lane.b32.xlu0 %v2621_v56, %s2294_s10  ;;  %v2624_v14 = vpop.f32.mrb[13].mxu1 }
 0x9c0   :  { %v2626_v6 = vpop.f32.mrb[14].mxu1 }
 0x9c1   :  { %1169 = vrot.lane.b32.xlu1 %v2626_v6, %s2294_s10  ;;  %v2629_v9 = vpop.f32.mrb[15].mxu1 }
 0x9c3   :  { %1187 = vrot.lane.b32.xlu0 %v2621_v56, %s2295_s18 }
 0x9c5   :  { %1189 = vrot.lane.b32.xlu1 %v2626_v6, %s2295_s18 }
 0x9c7   :  { %1207 = vrot.lane.b32.xlu0 %v2621_v56, %s2296_s22 }
 0x9c9   :  { %1209 = vrot.lane.b32.xlu1 %v2626_v6, %s2296_s22 }
 0x9cb   :  { %1227 = vrot.lane.b32.xlu0 %v2621_v56, %s2281_s20 }
 0x9cd   :  { %1229 = vrot.lane.b32.xlu1 %v2626_v6, %s2281_s20 }
 0x9cf   :  { %1247 = vrot.lane.b32.xlu0 %v2621_v56, %s2297_s8 }
 0x9d1   :  { %1249 = vrot.lane.b32.xlu1 %v2626_v6, %s2297_s8 }
 0x9d3   :  { %1163 = vrot.lane.b32.xlu0 %v2624_v14, %s2294_s10 }
 0x9d5   :  { %1165 = vrot.lane.b32.xlu1 %v2629_v9, %s2294_s10 }
 0x9d7   :  { %1183 = vrot.lane.b32.xlu0 %v2624_v14, %s2295_s18 }
 0x9d9   :  { %1185 = vrot.lane.b32.xlu1 %v2629_v9, %s2295_s18 }
 0x9db   :  { %1203 = vrot.lane.b32.xlu0 %v2624_v14, %s2296_s22 }
 0x9dd   :  { %1205 = vrot.lane.b32.xlu1 %v2629_v9, %s2296_s22 }
 0x9df   :  { %1223 = vrot.lane.b32.xlu0 %v2624_v14, %s2281_s20 }
 0x9e1   :  { %1225 = vrot.lane.b32.xlu1 %v2629_v9, %s2281_s20 }
 0x9e3   :  { %1243 = vrot.lane.b32.xlu0 %v2624_v14, %s2297_s8 }
 0x9e5   :  { %1245 = vrot.lane.b32.xlu1 %v2629_v9, %s2297_s8 }
 0x9e7   :  { %1263 = vrot.lane.b32.xlu0 %v2624_v14, %s2290_s0 }
 0x9e9   :  { %1265 = vrot.lane.b32.xlu1 %v2629_v9, %s2290_s0 }
 0x9eb   :  { %1283 = vrot.lane.b32.xlu0 %v2624_v14, %s2289_s29 }
 0x9ed   :  { %1285 = vrot.lane.b32.xlu1 %v2629_v9, %s2289_s29 }
 0x9ef   :  { %1267 = vrot.lane.b32.xlu0 %v2621_v56, %s2290_s0 }
 0x9f1   :  { %1269 = vrot.lane.b32.xlu1 %v2626_v6, %s2290_s0 }
 0x9f3   :  { %1287 = vrot.lane.b32.xlu0 %v2621_v56, %s2289_s29 }
 0x9f5   :  { %1289 = vrot.lane.b32.xlu1 %v2626_v6, %s2289_s29 }
 0xa31   :  { %v1168_v15 = vpop.permute.xlu0 %1167 }
 0xa32   :  { %v1177_v32 = vmax.f32 %v2621_v56, %v1168_v15  ;;  %v1181_v22 = vadd.f32 %v2621_v56, %v1168_v15 }
 0xa33   :  { %v1170_v33 = vpop.permute.xlu1 %1169 }
 0xa34   :  { %v1178_v34 = vmax.f32 %v2626_v6, %v1170_v33  ;;  %v1182_v26 = vadd.f32 %v2626_v6, %v1170_v33 }
 0xa35   :  { %v1188_v35 = vpop.permute.xlu0 %1187 }
 0xa36   :  { %v1197_v36 = vmax.f32 %v1177_v32, %v1188_v35  ;;  %v1201_v31 = vadd.f32 %v1188_v35, %v1181_v22 }
 0xa37   :  { %v1190_v37 = vpop.permute.xlu1 %1189 }
 0xa38   :  { %v1198_v38 = vmax.f32 %v1178_v34, %v1190_v37  ;;  %v1202_v34 = vadd.f32 %v1190_v37, %v1182_v26 }
 0xa39   :  { %v1208_v39 = vpop.permute.xlu0 %1207 }
 0xa3a   :  { %v1217_v40 = vmax.f32 %v1197_v36, %v1208_v39 }
 0xa3b   :  { %v1210_v41 = vpop.permute.xlu1 %1209 }
 0xa3c   :  { %v1218_v42 = vmax.f32 %v1198_v38, %v1210_v41  ;;  %v1221_v38 = vadd.f32 %v1208_v39, %v1201_v31 }
 0xa3d   :  { %v1228_v43 = vpop.permute.xlu0 %1227 }
 0xa3e   :  { %v2675_v44 = vmax.f32 %v1217_v40, %v1228_v43 }
 0xa3f   :  { %v1230_v45 = vpop.permute.xlu1 %1229 }
 0xa40   :  { %v2677_v46 = vmax.f32 %v1218_v42, %v1230_v45 }
 0xa41   :  { %v2679_v47 = vpop.permute.xlu0 %1247 }
 0xa42   :  { %v1257_v48 = vmax.f32 %v2675_v44, %v2679_v47  ;;  %v1222_v44 = vadd.f32 %v1210_v41, %v1202_v34 }
 0xa43   :  { %v2683_v49 = vpop.permute.xlu1 %1249 }
 0xa44   :  { %v1258_v50 = vmax.f32 %v2677_v46, %v2683_v49  ;;  %v2088_v46 = vld [vmem:[%s2846_s11 + $0x8] sm:$0xff]  }
 0xa45   :  { %v1164_v51 = vpop.permute.xlu0 %1163 }
 0xa46   :  { %v1175_v52 = vmax.f32 %v2624_v14, %v1164_v51  ;;  %v1179_v3 = vadd.f32 %v1164_v51, %v2624_v14 }
 0xa47   :  { %v1166_v53 = vpop.permute.xlu1 %1165 }
 0xa48   :  { %v1176_v55 = vmax.f32 %v2629_v9, %v1166_v53  ;;  %v1180_v7 = vadd.f32 %v1166_v53, %v2629_v9 }
 0xa49   :  { %v1184_v57 = vpop.permute.xlu0 %1183 }
 0xa4a   :  { %v1195_v58 = vmax.f32 %v1175_v52, %v1184_v57  ;;  %v1199_v8 = vadd.f32 %v1184_v57, %v1179_v3  ;;  %v1241_v52 = vadd.f32 %v1228_v43, %v1221_v38  ;;  %v1242_v57 = vadd.f32 %v1230_v45, %v1222_v44 }
 0xa4b   :  { %v1186_v59 = vpop.permute.xlu1 %1185 }
 0xa4c   :  { %v1196_v60 = vmax.f32 %v1176_v55, %v1186_v59  ;;  %v1200_v12 = vadd.f32 %v1186_v59, %v1180_v7  ;;  %v1261_v6 = vadd.f32 %v2679_v47, %v1241_v52  ;;  %v1262_v39 = vadd.f32 %v2683_v49, %v1242_v57  ;;  %v2089_v49 = vld [vmem:[%s2846_s11 + $0x10] sm:$0xff]   ;;  %v2100_v57 = vld [vmem:[%s2846_s11 + $0x68] sm:$0xff]  }
 0xa4d   :  { %v1204_v61 = vpop.permute.xlu0 %1203 }
 0xa4e   :  { %v1215_v62 = vmax.f32 %v1195_v58, %v1204_v61  ;;  %v1219_v13 = vadd.f32 %v1204_v61, %v1199_v8 }
 0xa4f   :  { %v1206_v63 = vpop.permute.xlu1 %1205 }
 0xa50   :  { %v1216_v0 = vmax.f32 %v1196_v60, %v1206_v63  ;;  %v1220_v18 = vadd.f32 %v1206_v63, %v1200_v12  ;;  %v2298_v63 = vmov 0  }
 0xa51   :  { %v1224_v1 = vpop.permute.xlu0 %1223  ;;  %1608 = vmatprep.subr.bf16.mxu0 %v2298_v63 }
 0xa52   :  { %v1235_v4 = vmax.f32 %v1215_v62, %v1224_v1  ;;  %v1239_v19 = vadd.f32 %v1224_v1, %v1219_v13 }
 0xa53   :  { %v1226_v5 = vpop.permute.xlu1 %1225 }
 0xa54   :  { %v1236_v10 = vmax.f32 %v1216_v0, %v1226_v5  ;;  %v1240_v23 = vadd.f32 %v1226_v5, %v1220_v18  ;;  %v2091_v5 = vld [vmem:[%s2846_s11 + $0x20] sm:$0xff]   ;;  %v2093_v18 = vld [vmem:[%s2846_s11 + $0x30] sm:$0xff]  }
 0xa55   :  { %v1244_v11 = vpop.permute.xlu0 %1243 }
 0xa56   :  { %v1255_v16 = vmax.f32 %v1235_v4, %v1244_v11  ;;  %v1259_v24 = vadd.f32 %v1244_v11, %v1239_v19 }
 0xa57   :  { %v1246_v17 = vpop.permute.xlu1 %1245 }
 0xa58   :  { %v1256_v20 = vmax.f32 %v1236_v10, %v1246_v17  ;;  %v1260_v14 = vadd.f32 %v1246_v17, %v1240_v23 }
 0xa59   :  { %v1264_v21 = vpop.permute.xlu0 %1263 }
 0xa5a   :  { %v1275_v25 = vmax.f32 %v1255_v16, %v1264_v21  ;;  %v1279_v9 = vadd.f32 %v1264_v21, %v1259_v24  ;;  %v2092_v16 = vld [vmem:[%s2846_s11 + $0x28] sm:$0xff]   ;;  %v2094_v24 = vld [vmem:[%s2846_s11 + $0x38] sm:$0xff]  }
 0xa5b   :  { %v1266_v30 = vpop.permute.xlu1 %1265 }
 0xa5c   :  { %v1276_v32 = vmax.f32 %v1256_v20, %v1266_v30  ;;  %v1280_v2 = vadd.f32 %v1266_v30, %v1260_v14 }
 0xa5d   :  { %v1284_v36 = vpop.permute.xlu0 %1283 }
 0xa5e   :  { %v1295_v40 = vmax.f32 %v1275_v25, %v1284_v36  ;;  %v1299_v42 = vadd.f32 %v1284_v36, %v1279_v9  ;;  %v2095_v9 = vld [vmem:[%s2846_s11 + $0x40] sm:$0xff]   ;;  %v2096_v36 = vld [vmem:[%s2846_s11 + $0x48] sm:$0xff]  }
 0xa5f   :  { %v1286_v51 = vpop.permute.xlu1 %1285 }
 0xa60   :  { %v1303_v56 = vmul.f32 0.125, %v1299_v42  ;;  %v1296_v15 = vmax.f32 %v1276_v32, %v1286_v51  ;;  %v1300_v53 = vadd.f32 %v1286_v51, %v1280_v2  ;;  %v2098_v51 = vld [vmem:[%s2846_s11 + $0x58] sm:$0xff]  }
 0xa61   :  { %v1268_v55 = vpop.permute.xlu0 %1267 }
 0xa62   :  { %v1304_v33 = vmul.f32 0.125, %v1300_v53  ;;  %v1277_v35 = vmax.f32 %v1257_v48, %v1268_v55  ;;  %1311 = vrot.lane.b32.xlu0 %v1303_v56, %s2289_s29  ;;  %v1281_v58 = vadd.f32 %v1268_v55, %v1261_v6  ;;  %v2087_v48 = vld [vmem:[%s2846_s11] sm:$0xff]  }
 0xa63   :  { %v1270_v37 = vpop.permute.xlu1 %1269  ;;  %1609 = vmatpush1.bf16.msra.mxu0 %v2087_v48 }
 0xa64   :  { %v1278_v41 = vmax.f32 %v1258_v50, %v1270_v37  ;;  %1313 = vrot.lane.b32.xlu1 %v1304_v33, %s2289_s29  ;;  %v1282_v59 = vadd.f32 %v1270_v37, %v1262_v39  ;;  %1610 = vmatprep.subr.bf16.mxu0 %v2298_v63  ;;  %v2090_v50 = vld [vmem:[%s2846_s11 + $0x18] sm:$0xff]  }
 0xa65   :  { %v1288_v43 = vpop.permute.xlu0 %1287 }
 0xa66   :  { %v1301_v60 = vadd.f32 %v1288_v43, %v1281_v58  ;;  %v1297_v7 = vmax.f32 %v1277_v35, %v1288_v43 }
 0xa67   :  { %v1290_v45 = vpop.permute.xlu1 %1289  ;;  %1611 = vmatpush1.bf16.msra.mxu0 %v2088_v46 }
 0xa68   :  { %v1305_v61 = vmul.f32 0.125, %v1301_v60  ;;  %v1302_v47 = vadd.f32 %v1290_v45, %v1282_v59  ;;  %1612 = vmatprep.subr.bf16.mxu0 %v2298_v63  ;;  %v1298_v10 = vmax.f32 %v1278_v41, %v1290_v45 }
 0xa6a   :  { %v1306_v62 = vmul.f32 0.125, %v1302_v47  ;;  %1315 = vrot.lane.b32.xlu0 %v1305_v61, %s2289_s29 }
 0xa6b   :  { %1613 = vmatpush1.bf16.msra.mxu0 %v2089_v49 }
 0xa6c   :  { %1317 = vrot.lane.b32.xlu1 %v1306_v62, %s2289_s29  ;;  %1614 = vmatprep.subr.bf16.mxu0 %v2298_v63  ;;  %s1707_s29 = sld [smem:[#allocation15]] }
 0xa6f   :  { %1615 = vmatpush1.bf16.msra.mxu0 %v2090_v50 }
 0xa70   :  { %1616 = vmatprep.subr.bf16.mxu0 %v2298_v63 }
 0xa73   :  { %1617 = vmatpush1.bf16.msra.mxu0 %v2091_v5 }
 0xa74   :  { %1618 = vmatprep.subr.bf16.mxu0 %v2298_v63 }
 0xa77   :  { %1619 = vmatpush1.bf16.msra.mxu0 %v2092_v16 }
 0xa78   :  { %1620 = vmatprep.subr.bf16.mxu0 %v2298_v63 }
 0xa7b   :  { %1621 = vmatpush1.bf16.msra.mxu0 %v2093_v18 }
 0xa7c   :  { %1622 = vmatprep.subr.bf16.mxu0 %v2298_v63 }
 0xa7f   :  { %1623 = vmatpush1.bf16.msra.mxu0 %v2094_v24 }
 0xa80   :  { %1624 = vmatprep.subr.bf16.mxu0 %v2298_v63 }
 0xa83   :  { %1625 = vmatpush1.bf16.msra.mxu0 %v2095_v9 }
 0xa84   :  { %1626 = vmatprep.subr.bf16.mxu0 %v2298_v63 }
 0xa87   :  { %1627 = vmatpush1.bf16.msra.mxu0 %v2096_v36 }
 0xa88   :  { %1628 = vmatprep.subr.bf16.mxu0 %v2298_v63 }
 0xad4   :  { %v1312_v0 = vpop.permute.xlu0 %1311 }
 0xad5   :  { %v1324_v1 = vsel %vm1323_vm13, %v1295_v40, %v1312_v0  ;;  %v2097_v40 = vld [vmem:[%s2846_s11 + $0x50] sm:$0xff]  }
 0xad6   :  { %1334 = vst.msk [vmem:[#allocation3 + $0x3] sm:$0xff] %vm1333_vm14, %v1324_v1  ;;  %v1314_v3 = vpop.permute.xlu1 %1313  ;;  %1629 = vmatpush1.bf16.msra.mxu0 %v2097_v40 }
 0xad7   :  { %v1325_v4 = vsel %vm1323_vm13, %v1296_v15, %v1314_v3  ;;  %1630 = vmatprep.subr.bf16.mxu0 %v2298_v63  ;;  %v2099_v15 = vld [vmem:[%s2846_s11 + $0x60] sm:$0xff]  }
 0xad8   :  { %1335 = vst.msk [vmem:[#allocation3 + $0xb] sm:$0xff] %vm1333_vm14, %v1325_v4 }
 0xada   :  { %1631 = vmatpush1.bf16.msra.mxu0 %v2098_v51 }
 0xadb   :  { %1632 = vmatprep.subr.bf16.mxu0 %v2298_v63 }
 0xadc   :  { %v1316_v8 = vpop.permute.xlu0 %1315 }
 0xadd   :  { %v1326_v11 = vsel %vm1323_vm13, %v1297_v7, %v1316_v8  ;;  %v1338_v13 = vld [vmem:[#allocation3] sm:$0xff] }
 0xade   :  { %1336 = vst.msk [vmem:[#allocation3 + $0x1b] sm:$0xff] %vm1333_vm14, %v1326_v11  ;;  %v1318_v12 = vpop.permute.xlu1 %1317  ;;  %1342 = vst.msk [vmem:[#allocation4] sm:$0xff] %vm1333_vm14, %v1338_v13  ;;  %v1346_v26 = vld [vmem:[#allocation3 + $0x1] sm:$0xff]  ;;  %1633 = vmatpush1.bf16.msra.mxu0 %v2099_v15 }
 0xadf   :  { %v1327_v17 = vsel %vm1323_vm13, %v1298_v10, %v1318_v12  ;;  %v1339_v19 = vld [vmem:[#allocation3 + $0x8] sm:$0xff]  ;;  %1634 = vmatprep.subr.bf16.mxu0 %v2298_v63 }
 0xae0   :  { %1337 = vst.msk [vmem:[#allocation3 + $0x23] sm:$0xff] %vm1333_vm14, %v1327_v17  ;;  %1343 = vst.msk [vmem:[#allocation4 + $0x10] sm:$0xff] %vm1333_vm14, %v1339_v19  ;;  %v1422_v20 = vld [vmem:[#allocation3 + $0xc] sm:$0xff]  ;;  %v1421_v21 = vld [vmem:[#allocation3 + $0x4] sm:$0xff] }
 0xae1   :  { %1426 = vst.msk [vmem:[#allocation4 + $0x18] sm:$0xff] %vm1333_vm14, %v1422_v20  ;;  %1425 = vst.msk [vmem:[#allocation4 + $0x8] sm:$0xff] %vm1333_vm14, %v1421_v21  ;;  %v1371_v34 = vld [vmem:[#allocation3 + $0x2] sm:$0xff]  ;;  %v1430_v42 = vld [vmem:[#allocation3 + $0xd] sm:$0xff] }
 0xae2   :  { %v1347_v38 = vld [vmem:[#allocation3 + $0x9] sm:$0xff]  ;;  %1635 = vmatpush1.bf16.msra.mxu0 %v2100_v57 }
 0xae3   :  { %v1396_v2 = vld [vmem:[#allocation3 + $0x3] sm:$0xff]  ;;  %v1454_v6 = vld [vmem:[#allocation3 + $0xe] sm:$0xff] }
 0xae4   :  { %v1372_v52 = vld [vmem:[#allocation3 + $0xa] sm:$0xff] }
 0xae5   :  { %v1348_v22 = vld [vmem:[#allocation3 + $0x19] sm:$0xff]  ;;  %v1429_v56 = vld [vmem:[#allocation3 + $0x5] sm:$0xff] }
 0xae6   :  { %1358 = vrot.lane.b32.xlu0 %v1348_v22, %s2290_s0  ;;  %v1340_v23 = vld [vmem:[#allocation3 + $0x18] sm:$0xff]  ;;  %v1453_v55 = vld [vmem:[#allocation3 + $0x6] sm:$0xff] }
 0xae7   :  { %v1349_v25 = vld [vmem:[#allocation3 + $0x21] sm:$0xff]  ;;  %1344 = vst.msk [vmem:[#allocation4 + $0x20] sm:$0xff] %vm1333_vm14, %v1340_v23  ;;  %v1397_v35 = vld [vmem:[#allocation3 + $0xb] sm:$0xff] }
 0xae8   :  { %1360 = vrot.lane.b32.xlu1 %v1349_v25, %s2290_s0  ;;  %v1341_v30 = vld [vmem:[#allocation3 + $0x20] sm:$0xff] }
 0xae9   :  { %v1424_v31 = vld [vmem:[#allocation3 + $0x24] sm:$0xff]  ;;  %1345 = vst.msk [vmem:[#allocation4 + $0x30] sm:$0xff] %vm1333_vm14, %v1341_v30  ;;  %v1423_v14 = vld [vmem:[#allocation3 + $0x1c] sm:$0xff] }
 0xaea   :  { %1354 = vrot.lane.b32.xlu0 %v1346_v26, %s2290_s0  ;;  %1428 = vst.msk [vmem:[#allocation4 + $0x38] sm:$0xff] %vm1333_vm14, %v1424_v31  ;;  %v1432_v32 = vld [vmem:[#allocation3 + $0x25] sm:$0xff]  ;;  %1427 = vst.msk [vmem:[#allocation4 + $0x28] sm:$0xff] %vm1333_vm14, %v1423_v14  ;;  %v1431_v44 = vld [vmem:[#allocation3 + $0x1d] sm:$0xff] }
 0xaeb   :  { %v1374_v53 = vld [vmem:[#allocation3 + $0x22] sm:$0xff]  ;;  %v1373_v33 = vld [vmem:[#allocation3 + $0x1a] sm:$0xff] }
 0xaec   :  { %1443 = vrot.lane.b32.xlu1 %v1432_v32, %s2290_s0  ;;  %v1455_v37 = vld [vmem:[#allocation3 + $0x1e] sm:$0xff]  ;;  %v1456_v39 = vld [vmem:[#allocation3 + $0x26] sm:$0xff] }
 0xaed   :  { %v1398_v58 = vld [vmem:[#allocation3 + $0x1b] sm:$0xff]  ;;  %v1399_v41 = vld [vmem:[#allocation3 + $0x23] sm:$0xff] }
 0xaee   :  { %1379 = vrot.lane.b32.xlu0 %v1371_v34, %s2281_s20 }
 0xaf0   :  { %1356 = vrot.lane.b32.xlu1 %v1347_v38, %s2290_s0 }
 0xaf2   :  { %1404 = vrot.lane.b32.xlu0 %v1396_v2, %s2295_s18 }
 0xaf4   :  { %1439 = vrot.lane.b32.xlu1 %v1430_v42, %s2290_s0 }
 0xaf6   :  { %1441 = vrot.lane.b32.xlu0 %v1431_v44, %s2290_s0 }
 0xaf8   :  { %1381 = vrot.lane.b32.xlu1 %v1372_v52, %s2281_s20 }
 0xafa   :  { %1437 = vrot.lane.b32.xlu0 %v1429_v56, %s2290_s0 }
 0xafc   :  { %1385 = vrot.lane.b32.xlu1 %v1374_v53, %s2281_s20 }
 0xafe   :  { %1461 = vrot.lane.b32.xlu0 %v1453_v55, %s2281_s20 }
 0xb00   :  { %1463 = vrot.lane.b32.xlu1 %v1454_v6, %s2281_s20 }
 0xb02   :  { %1383 = vrot.lane.b32.xlu0 %v1373_v33, %s2281_s20 }
 0xb04   :  { %1406 = vrot.lane.b32.xlu1 %v1397_v35, %s2295_s18 }
 0xb06   :  { %1465 = vrot.lane.b32.xlu0 %v1455_v37, %s2281_s20 }
 0xb08   :  { %1467 = vrot.lane.b32.xlu1 %v1456_v39, %s2281_s20 }
 0xb0a   :  { %1408 = vrot.lane.b32.xlu0 %v1398_v58, %s2295_s18 }
 0xb0c   :  { %1410 = vrot.lane.b32.xlu1 %v1399_v41, %s2295_s18 }
 0xb58   :  { %v1359_v43 = vpop.permute.xlu0 %1358 }
 0xb59   :  { %1369 = vst.msk [vmem:[#allocation4 + $0x20] sm:$0xff] %vm1366_vm15, %v1359_v43 }
 0xb5a   :  { %v1361_v59 = vpop.permute.xlu1 %1360 }
 0xb5b   :  { %1370 = vst.msk [vmem:[#allocation4 + $0x30] sm:$0xff] %vm1366_vm15, %v1361_v59 }
 0xb5c   :  { %v1355_v60 = vpop.permute.xlu0 %1354 }
 0xb5d   :  { %1367 = vst.msk [vmem:[#allocation4] sm:$0xff] %vm1366_vm15, %v1355_v60 }
 0xb5e   :  { %v1444_v45 = vpop.permute.xlu1 %1443 }
 0xb5f   :  { %1452 = vst.msk [vmem:[#allocation4 + $0x38] sm:$0xff] %vm1366_vm15, %v1444_v45 }
 0xb60   :  { %v1380_v61 = vpop.permute.xlu0 %1379 }
 0xb61   :  { %1392 = vst.msk [vmem:[#allocation4] sm:$0xff] %vm1391_vm0, %v1380_v61 }
 0xb62   :  { %v1357_v47 = vpop.permute.xlu1 %1356 }
 0xb63   :  { %1368 = vst.msk [vmem:[#allocation4 + $0x10] sm:$0xff] %vm1366_vm15, %v1357_v47 }
 0xb64   :  { %v1405_v62 = vpop.permute.xlu0 %1404 }
 0xb65   :  { %1417 = vst.msk [vmem:[#allocation4] sm:$0xff] %vm1416_vm1, %v1405_v62 }
 0xb66   :  { %v1440_v48 = vpop.permute.xlu1 %1439 }
 0xb67   :  { %1450 = vst.msk [vmem:[#allocation4 + $0x18] sm:$0xff] %vm1366_vm15, %v1440_v48 }
 0xb68   :  { %v1442_v63 = vpop.permute.xlu0 %1441 }
 0xb69   :  { %1451 = vst.msk [vmem:[#allocation4 + $0x28] sm:$0xff] %vm1366_vm15, %v1442_v63 }
 0xb6a   :  { %v1382_v46 = vpop.permute.xlu1 %1381 }
 0xb6b   :  { %1393 = vst.msk [vmem:[#allocation4 + $0x10] sm:$0xff] %vm1391_vm0, %v1382_v46 }
 0xb6c   :  { %v1438_v49 = vpop.permute.xlu0 %1437  ;;  %v1477_v16 = vld [vmem:[#allocation4] sm:$0xff] }
 0xb6d   :  { %1449 = vst.msk [vmem:[#allocation4 + $0x8] sm:$0xff] %vm1366_vm15, %v1438_v49 }
 0xb6e   :  { %v1386_v50 = vpop.permute.xlu1 %1385 }
 0xb6f   :  { %1395 = vst.msk [vmem:[#allocation4 + $0x30] sm:$0xff] %vm1391_vm0, %v1386_v50 }
 0xb70   :  { %v1462_v0 = vpop.permute.xlu0 %1461 }
 0xb71   :  { %1473 = vst.msk [vmem:[#allocation4 + $0x8] sm:$0xff] %vm1391_vm0, %v1462_v0  ;;  %v1708_v0 = vstv %s1707_s29 }
 0xb72   :  { %v1464_v1 = vpop.permute.xlu1 %1463 }
 0xb73   :  { %1474 = vst.msk [vmem:[#allocation4 + $0x18] sm:$0xff] %vm1391_vm0, %v1464_v1 }
 0xb74   :  { %v1384_v3 = vpop.permute.xlu0 %1383 }
 0xb75   :  { %1394 = vst.msk [vmem:[#allocation4 + $0x20] sm:$0xff] %vm1391_vm0, %v1384_v3 }
 0xb76   :  { %v1407_v4 = vpop.permute.xlu1 %1406 }
 0xb77   :  { %1418 = vst.msk [vmem:[#allocation4 + $0x10] sm:$0xff] %vm1416_vm1, %v1407_v4 }
 0xb78   :  { %v1466_v5 = vpop.permute.xlu0 %1465  ;;  %v1478_v8 = vld [vmem:[#allocation4 + $0x8] sm:$0xff] }
 0xb79   :  { %1475 = vst.msk [vmem:[#allocation4 + $0x28] sm:$0xff] %vm1391_vm0, %v1466_v5 }
 0xb7a   :  { %v1468_v7 = vpop.permute.xlu1 %1467  ;;  %v1480_v10 = vld [vmem:[#allocation4 + $0x18] sm:$0xff] }
 0xb7b   :  { %1476 = vst.msk [vmem:[#allocation4 + $0x38] sm:$0xff] %vm1391_vm0, %v1468_v7  ;;  %v1486_v11 = vpack.c.bf16 %v1480_v10, %v1478_v8  ;;  %v1714_v7 = vstv %s1828_s6 }
 0xb7c   :  { %v1409_v12 = vpop.permute.xlu0 %1408 }
 0xb7d   :  { %1419 = vst.msk [vmem:[#allocation4 + $0x20] sm:$0xff] %vm1416_vm1, %v1409_v12  ;;  %1826 = vmatprep.mubr.msk.bf16.mxu0 %vm1601_vm2, %v1486_v11 }
 0xb7e   :  { %v1411_v13 = vpop.permute.xlu1 %1410  ;;  %v1479_v17 = vld [vmem:[#allocation4 + $0x10] sm:$0xff] }
 0xb7f   :  { %1420 = vst.msk [vmem:[#allocation4 + $0x30] sm:$0xff] %vm1416_vm1, %v1411_v13  ;;  %v1485_v18 = vpack.c.bf16 %v1479_v17, %v1477_v16 }
 0xb80   :  { %v1482_v19 = vld [vmem:[#allocation4 + $0x28] sm:$0xff] }
 0xb81   :  { %1641 = vmatmul.mubr.bf16.vlgmr.msra.gmra.mrb[8].mxu0 %v1485_v18 }
 0xb82   :  { %v1484_v20 = vld [vmem:[#allocation4 + $0x38] sm:$0xff] }
 0xb83   :  { %v1488_v21 = vpack.c.bf16 %v1484_v20, %v1482_v19 }
 0xb84   :  { %v1481_v22 = vld [vmem:[#allocation4 + $0x20] sm:$0xff] }
 0xb85   :  { %1827 = vmatprep.mubr.msk.bf16.mxu0 %vm1601_vm2, %v1488_v21 }
 0xb86   :  { %v1483_v23 = vld [vmem:[#allocation4 + $0x30] sm:$0xff] }
 0xb87   :  { %v1487_v24 = vpack.c.bf16 %v1483_v23, %v1481_v22 }
 0xb89   :  { %1649 = vmatmul.mubr.bf16.gmra.mrb[12].mxu0 %v1487_v24 }
 0xc54   :  { %v1642_v25 = vpop.f32.mrb[8].mxu0 }
 0xc55   :  { %v1644_v26 = vpop.f32.mrb[9].mxu0  ;;  %v1672_v31 = vmul.f32 %v1642_v25, %v1642_v25 }
 0xc56   :  { %v1645_v30 = vpop.f32.mrb[10].mxu0 }
 0xc57   :  { %v1657_v14 = vadd.f32 %v1645_v30, %v1642_v25  ;;  %v1673_v9 = vmul.f32 %v1645_v30, %v1645_v30  ;;  %v1647_v32 = vpop.f32.mrb[11].mxu0 }
 0xc59   :  { %v1676_v34 = vadd.f32 %v1673_v9, %v1672_v31 }
 0xc5c   :  { %v1650_v36 = vpop.f32.mrb[12].mxu0 }
 0xc5d   :  { %v1674_v38 = vmul.f32 %v1650_v36, %v1650_v36  ;;  %v1652_v2 = vpop.f32.mrb[13].mxu0  ;;  %v1658_v40 = vadd.f32 %v1657_v14, %v1650_v36 }
 0xc5e   :  { %v1653_v42 = vpop.f32.mrb[14].mxu0 }
 0xc5f   :  { %v1655_v44 = vpop.f32.mrb[15].mxu0  ;;  %v1659_v51 = vadd.f32 %v1658_v40, %v1653_v42  ;;  %v1675_v52 = vmul.f32 %v1653_v42, %v1653_v42  ;;  %v1677_v56 = vadd.f32 %v1676_v34, %v1674_v38 }
 0xc61   :  { %1660 = vadd.xlane.f32.xlu0 %v1659_v51  ;;  %v1678_v15 = vadd.f32 %v1677_v56, %v1675_v52 }
 0xc63   :  { %1679 = vadd.xlane.f32.xlu1 %v1678_v15 }
 0xcee   :  { %v1661_v53 = vpop.xlane.xlu0 %1660 }
 0xcef   :  { %v1662_v55 = vrot.slane %v1661_v53, 4 }
 0xcf0   :  { %v1680_v57 = vpop.xlane.xlu1 %1679 }
 0xcf1   :  { %v1663_v6 = vadd.f32 %v1662_v55, %v1661_v53  ;;  %v1681_v33 = vrot.slane %v1680_v57, 4 }
 0xcf3   :  { %v1664_v35 = vrot.slane %v1663_v6, 2  ;;  %v1682_v37 = vadd.f32 %v1681_v33, %v1680_v57 }
 0xcf5   :  { %v1683_v39 = vrot.slane %v1682_v37, 2  ;;  %v1665_v58 = vadd.f32 %v1664_v35, %v1663_v6 }
 0xcf7   :  { %v1684_v41 = vadd.f32 %v1683_v39, %v1682_v37  ;;  %v1666_v43 = vrot.slane %v1665_v58, 1 }
 0xcf9   :  { %v1667_v59 = vadd.f32 %v1666_v43, %v1665_v58  ;;  %v1685_v60 = vrot.slane %v1684_v41, 1 }
 0xcfb   :  { %2027 = vpush %v1667_v59  ;;  %v1686_v45 = vadd.f32 %v1685_v60, %v1684_v41 }
 0xcfd   :  { %2029 = vpush %v1686_v45 }
 0xd2c   :  { %s2028_s11 = spop %2027 }
 0xd2d   :  { %s1671_s20 = smul.f32 0.00024414063, %s2028_s11 }
 0xd2e   :  { %s2030_s0 = spop %2029 }
 0xd2f   :  { %s1691_s18 = smul.f32 %s1671_s20, %s1671_s20  ;;  %v1693_v61 = vstv %s1671_s20 }
 0xd30   :  { %s1690_s4 = smul.f32 0.00024414063, %s2030_s0  ;;  %v1694_v47 = vsub.f32 %v1642_v25, %v1693_v61  ;;  %v1695_v62 = vsub.f32 %v1645_v30, %v1693_v61  ;;  %v1696_v48 = vsub.f32 %v1650_v36, %v1693_v61  ;;  %v1697_v63 = vsub.f32 %v1653_v42, %v1693_v61 }
 0xd32   :  { %s1692_s24 = ssub.f32 %s1690_s4, %s1691_s18 }
 0xd34   :  { %s1698_s25 = sadd.f32 1e-05, %s1692_s24 }
 0xd36   :  { %v1699_v46 = vstv %s1698_s25 }
 0xd37   :  { %2107 = vrsqrt.f32 %v1699_v46 }
 0xd41   :  { %v2108_v49 = vpop.eup %2107 }
 0xd42   :  { %2031 = vpush %v2108_v49 }
 0xd73   :  { %s2032_s27 = spop %2031 }
 0xd74   :  { %v1702_v50 = vstv %s2032_s27 }
 0xd75   :  { %v1703_v1 = vmul.f32 %v1702_v50, %v1694_v47  ;;  %v1704_v3 = vmul.f32 %v1702_v50, %v1695_v62  ;;  %v1705_v4 = vmul.f32 %v1702_v50, %v1696_v48  ;;  %v1706_v5 = vmul.f32 %v1702_v50, %v1697_v63 }
 0xd77   :  { %v1709_v8 = vmul.f32 %v1708_v0, %v1703_v1  ;;  %v1710_v10 = vmul.f32 %v1708_v0, %v1704_v3  ;;  %v1711_v11 = vmul.f32 %v1708_v0, %v1705_v4  ;;  %v1712_v12 = vmul.f32 %v1708_v0, %v1706_v5 }
 0xd79   :  { %v1715_v13 = vadd.f32 %v1714_v7, %v1709_v8  ;;  %v1716_v16 = vadd.f32 %v1714_v7, %v1710_v10  ;;  %v1717_v17 = vadd.f32 %v1714_v7, %v1711_v11  ;;  %v1718_v18 = vadd.f32 %v1714_v7, %v1712_v12 }
 0xd7b   :  { %v1829_v19 = vmul.f32 -1.442695, %v1715_v13  ;;  %v1830_v20 = vmul.f32 -1.442695, %v1716_v16  ;;  %v1831_v21 = vmul.f32 -1.442695, %v1717_v17 }
 0xd7c   :  { %v1832_v22 = vmul.f32 -1.442695, %v1718_v18 }
 0xd7d   :  { %2109 = vpow2.f32 %v1829_v19 }
 0xd7e   :  { %2111 = vpow2.f32 %v1830_v20 }
 0xd7f   :  { %2113 = vpow2.f32 %v1831_v21 }
 0xd80   :  { %2115 = vpow2.f32 %v1832_v22 }
 0xd87   :  { %v2110_v23 = vpop.eup %2109 }
 0xd88   :  { %v2112_v24 = vpop.eup %2111  ;;  %v1731_v25 = vadd.f32 1.0, %v2110_v23 }
 0xd89   :  { %v2114_v26 = vpop.eup %2113  ;;  %v1732_v30 = vadd.f32 1.0, %v2112_v24 }
 0xd8a   :  { %v2116_v31 = vpop.eup %2115  ;;  %v1733_v14 = vadd.f32 1.0, %v2114_v26  ;;  %2117 = vrcp.f32 %v1731_v25 }
 0xd8b   :  { %v1734_v9 = vadd.f32 1.0, %v2116_v31  ;;  %2119 = vrcp.f32 %v1732_v30 }
 0xd8c   :  { %2121 = vrcp.f32 %v1733_v14 }
 0xd8d   :  { %2123 = vrcp.f32 %v1734_v9 }
 0xd94   :  { %v2118_v32 = vpop.eup %2117 }
 0xd95   :  { %v2120_v34 = vpop.eup %2119  ;;  %v1743_v36 = vmul.f32 %v2118_v32, %v2606_v27 }
 0xd96   :  { %v2122_v38 = vpop.eup %2121  ;;  %v1744_v2 = vmul.f32 %v2120_v34, %v2609_v28 }
 0xd97   :  { %v2124_v40 = vpop.eup %2123  ;;  %v1745_v42 = vmul.f32 %v2122_v38, %v2612_v29  ;;  %1747 = vst [vmem:[#allocation16] sm:$0xff] %v1743_v36 }
 0xd98   :  { %v1746_v44 = vmul.f32 %v2124_v40, %v2615_v54  ;;  %1748 = vst [vmem:[#allocation16 + $0x8] sm:$0xff] %v1744_v2 }
 0xd99   :  { %1749 = vst [vmem:[#allocation16 + $0x10] sm:$0xff] %v1745_v42 }
 0xd9a   :  { %1750 = vst [vmem:[#allocation16 + $0x18] sm:$0xff] %v1746_v44 }
 0xd9b   :  { %2258 = shalt.err (!%p2255_p7)
}
 0xd9c   :  { %s2259_s14 = scalar_lea.hbm %s2848_s13, 512 }
 0xd9d   :  { %p2260_p8 = scmp.ne.s32.totalorder %s2848_s13, %s2259_s14  ;;  %p2263_p9 = scmp.lt.u32.totalorder %s2259_s14, %s2848_s13 }
 0xd9f   :  { %p2265_p10 = pnand %p2263_p9, %p2260_p8 }
 0xda1   :  { %2268 = shalt.err (!%p2265_p10)
}
 0xda2   :  { %s2300_s1 = smov 128  }
 0xda3   :  { %1762 = dma.vmem_to_hbm [thread:$0]  %s1757_s9, 512, %s2848_s13, [#allocation7], %s2300_s1, %s2300_s1, %s2288_s7  }
 0xda4   :  { %2277 = dma.done.wait [#allocation7], 512  }
 0xda5   :  { %2278 = vsyncadd [#allocation7], 4294966784 }
 0xda6   :  { %1766 = vsyncpa [#allocation6], 1 }
 0xda7   :  { %1767 = vsyncpa [#allocation10], 1 }
 0xda8   :  { %1768 = vsyncpa [#allocation13], 1 }
 0xda9   :  { %1769 = vsyncpa [#allocation7], 1 }
 0xdaa   :  { %1770 = vsyncpa [#allocation8], 1 }

</bundles_post_ra>
